<compile_context>
chip_gen: v5e
topology: v5e:2x2
jax: 0.10.0
libtpu: 0.0.40
codegen_flags: <defaults>
</compile_context>

<pallas_src>
import functools
import math

import jax
import jax.numpy as jnp
from jax.experimental import pallas as pl
from jax.experimental.pallas import tpu as pltpu


def _attn_kernel(x_ref, wqkv_ref, wot_ref, o_ref, *, num_heads, d_head,
                 compute_dtype):
    # x_ref:    (Bt, P, D)   block of the batch
    # wqkv_ref: (D, 3F)      fused [Q | K | V] projection, F = H * dh
    # wot_ref:  (F, D)       output projection (W_O transposed)
    # o_ref:    (Bt, P, D)
    Bt, P, D = x_ref.shape
    H, dh = num_heads, d_head
    F = H * dh
    scale = 1.0 / math.sqrt(dh)
    cd = compute_dtype

    # ---- fused QKV projection: one lane-dense MXU matmul for the whole block.
    x2 = x_ref[...].reshape(Bt * P, D).astype(cd)            # (N, D)
    qkv = jnp.dot(x2, wqkv_ref[...].astype(cd),
                  preferred_element_type=jnp.float32)        # (N, 3F) f32

    q = (qkv[:, 0 * F:1 * F] * scale).astype(cd)             # scale q, not scores
    k = qkv[:, 1 * F:2 * F].astype(cd)
    v = qkv[:, 2 * F:3 * F].astype(cd)

    # ---- causal mask built in-kernel (no HBM mask DMA), hoisted out of the loop.
    rows = jax.lax.broadcasted_iota(jnp.int32, (P, P), 0)
    cols = jax.lax.broadcasted_iota(jnp.int32, (P, P), 1)
    causal = (rows >= cols)[None, :, :]                      # (1, P, P)

    # ---- attention core, per batch element in the block (static unroll; the
    # whole batch is folded into one grid step by default).
    z_slabs = []
    for b in range(Bt):
        sl = slice(b * P, (b + 1) * P)
        qh = jnp.transpose(q[sl].reshape(P, H, dh), (1, 0, 2))   # (H, Q, dh)
        kh = jnp.transpose(k[sl].reshape(P, H, dh), (1, 0, 2))   # (H, K, dh)
        vh = jnp.transpose(v[sl].reshape(P, H, dh), (1, 0, 2))   # (H, K, dh)
        kt = jnp.swapaxes(kh, 1, 2)                              # (H, dh, K)

        # MXU-natural batched matmul: contract dh = lane(LHS) x sublane(RHS).
        scores = jnp.einsum('iqh,ihp->iqp', qh, kt,
                            preferred_element_type=jnp.float32)  # (H, Q, K)
        scores = jnp.where(causal, scores, -1e10)
        attn = jax.nn.softmax(scores, axis=-1)                   # f32 softmax

        # PV matmul (probs cast to compute dtype, accumulation in f32).
        z = jnp.einsum('iqp,iph->iqh', attn.astype(cd), vh,
                       preferred_element_type=jnp.float32)       # (H, Q, dh)
        # lane-dense (Q, F) slab, f = i*dh + h (matches W_O's column order)
        z_slabs.append(jnp.transpose(z, (1, 0, 2)).reshape(P, F))

    z_all = z_slabs[0] if Bt == 1 else jnp.concatenate(z_slabs, axis=0)  # (N, F)

    # ---- output projection: one flat (N, F) x (F, D) matmul, D in the lane axis.
    out = jnp.dot(z_all.astype(cd), wot_ref[...].astype(cd),
                  preferred_element_type=jnp.float32)            # (N, D)
    o_ref[...] = out.reshape(Bt, P, D).astype(o_ref.dtype)


def attention_forward(x, w_k, w_q, w_v, w_o, *, batch_block=None,
                      compute_dtype=jnp.float32):
    """x: (B, P, D); w_k/w_q/w_v: (H, dh, D); w_o: (D, H*dh).

    batch_block=None folds the whole batch into one grid step (best on
    single-TC v5e/v6e); batch_block=1 keeps a parallel batch grid (best on
    dual-TC v7x). compute_dtype=jnp.bfloat16 enables the bf16-MXU path.
    """
    B, P, D = x.shape
    H, dh, _ = w_q.shape
    F = H * dh

    # Glue: fuse the QKV weights into a single (D, 3F) operand and transpose
    # W_O to (F, D) so both projections are flat, lane-dense matmuls.
    def to_df(w):  # (H, dh, D) -> (D, F) with f = i*dh + h
        return jnp.transpose(w, (2, 0, 1)).reshape(D, F)

    w_qkv = jnp.concatenate([to_df(w_q), to_df(w_k), to_df(w_v)], axis=1)  # (D, 3F)
    w_o_t = jnp.transpose(w_o, (1, 0))                                     # (F, D)

    bb = B if batch_block is None else batch_block
    assert B % bb == 0, "batch_block must divide batch"
    grid = (B // bb,)

    kernel = functools.partial(_attn_kernel, num_heads=H, d_head=dh,
                               compute_dtype=compute_dtype)

    return pl.pallas_call(
        kernel,
        out_shape=jax.ShapeDtypeStruct((B, P, D), x.dtype),
        grid_spec=pltpu.PrefetchScalarGridSpec(
            num_scalar_prefetch=0,
            grid=grid,
            in_specs=[
                pl.BlockSpec((bb, P, D), lambda g: (g, 0, 0)),   # x
                pl.BlockSpec((D, 3 * F), lambda g: (0, 0)),      # fused W_QKV
                pl.BlockSpec((F, D), lambda g: (0, 0)),          # W_O^T
            ],
            out_specs=pl.BlockSpec((bb, P, D), lambda g: (g, 0, 0)),
        ),
        compiler_params=pltpu.CompilerParams(
            dimension_semantics=("parallel",)),
    )(x, w_qkv, w_o_t)


def attention_reference(x, w_k, w_q, w_v, w_o, mask, d_head):
    """Pure-JAX reference mirroring the PyTorch forward exactly."""
    P = x.shape[-2]
    k = jnp.einsum('ihd,bpd->biph', w_k, x)
    q = jnp.einsum('ihd,bpd->biph', w_q, x)
    v = jnp.einsum('ihd,bpd->biph', w_v, x)
    scores = jnp.einsum('biph,biqh->biqp', k, q)
    m = mask[:P, :P]
    scores_masked = scores * m - 1e10 * (1.0 - m)
    attn = jax.nn.softmax(scores_masked / math.sqrt(d_head), axis=-1)
    z = jnp.einsum('biph,biqp->biqh', v, attn)
    B, H, Q, dh = z.shape
    z_flat = jnp.transpose(z, (0, 2, 1, 3)).reshape(B, Q, H * dh)
    return jnp.einsum('df,bqf->bqd', w_o, z_flat)


if __name__ == "__main__":
    # Small shapes consistent with the module.
    batch = 2
    d_model = 32
    num_heads = 4
    d_head = 8
    n_ctx = 8
    seq = 8  # <= n_ctx

    key = jax.random.PRNGKey(0)
    k0, k1, k2, k3, k4 = jax.random.split(key, 5)

    W_K = jax.random.normal(k0, (num_heads, d_head, d_model), jnp.float32) / math.sqrt(d_model)
    W_Q = jax.random.normal(k1, (num_heads, d_head, d_model), jnp.float32) / math.sqrt(d_model)
    W_V = jax.random.normal(k2, (num_heads, d_head, d_model), jnp.float32) / math.sqrt(d_model)
    W_O = jax.random.normal(k3, (d_model, d_head * num_heads), jnp.float32) / math.sqrt(d_model)
    mask = jnp.tril(jnp.ones((n_ctx, n_ctx), jnp.float32))

    x = jax.random.normal(k4, (batch, seq, d_model), jnp.float32)

    ref = attention_reference(x, W_K, W_Q, W_V, W_O, mask, d_head)

    # Default: batch folded into a single grid step (v5e/v6e-friendly), f32.
    out = jax.block_until_ready(attention_forward(x, W_K, W_Q, W_V, W_O))
    assert out.shape == (batch, seq, d_model)
    assert jnp.allclose(out, ref, atol=1e-4, rtol=1e-4), "f32 folded-batch mismatch"

    # v7x path: parallel batch grid (one batch element per TensorCore).
    out_par = jax.block_until_ready(
        attention_forward(x, W_K, W_Q, W_V, W_O, batch_block=1))
    assert jnp.allclose(out_par, ref, atol=1e-4, rtol=1e-4), "parallel-grid mismatch"

    # v6e/v7x path: bf16 MXU operands, f32 softmax + accumulation.
    out_bf16 = jax.block_until_ready(
        attention_forward(x, W_K, W_Q, W_V, W_O, compute_dtype=jnp.bfloat16))
    assert jnp.allclose(out_bf16, ref, atol=5e-2, rtol=5e-2), "bf16 path mismatch"

    print("KERNEL_OK")
</pallas_src>

<mosaic_0001>
module attributes {stable_mosaic.version = 11 : i64} {
  func.func @_attn_kernel(%arg0: i32, %arg1: memref<2x8x32xf32, #tpu.memory_space<vmem>>, %arg2: memref<32x96xf32, #tpu.memory_space<vmem>>, %arg3: memref<32x32xf32, #tpu.memory_space<vmem>>, %arg4: memref<2x8x32xf32, #tpu.memory_space<vmem>>) attributes {dimension_semantics = [#tpu.dimension_semantics<parallel>], iteration_bounds = array<i64: 1>, scalar_prefetch = 0 : i64, scratch_operands = 0 : i64, tpu.core_type = #tpu.core_type<tc>, window_params = [{transform_indices = @transform_0, window_bounds = array<i64: 2, 8, 32>}, {pipeline_mode = #tpu.pipeline_mode<synchronous>, transform_indices = @transform_1, window_bounds = array<i64: 32, 96>}, {pipeline_mode = #tpu.pipeline_mode<synchronous>, transform_indices = @transform_2, window_bounds = array<i64: 32, 32>}, {transform_indices = @transform_3, window_bounds = array<i64: 2, 8, 32>}]} {
    %c0 = arith.constant 0 : index
    %c0_0 = arith.constant 0 : index
    %c0_1 = arith.constant 0 : index
    %0 = vector.load %arg1[%c0, %c0_0, %c0_1] : memref<2x8x32xf32, #tpu.memory_space<vmem>>, vector<2x8x32xf32>
    %1 = vector.shape_cast %0 : vector<2x8x32xf32> to vector<16x32xf32>
    %c0_2 = arith.constant 0 : index
    %c0_3 = arith.constant 0 : index
    %2 = vector.load %arg2[%c0_2, %c0_3] : memref<32x96xf32, #tpu.memory_space<vmem>>, vector<32x96xf32>
    %cst = arith.constant dense<0.000000e+00> : vector<16x96xf32>
    %3 = tpu.matmul %1, %2, %cst {dimension_numbers = #tpu.dot_dimension_numbers<[1], [0], [0], [1], [0, 0, 1, 1], [], []>} : vector<16x32xf32>, vector<32x96xf32>, vector<16x96xf32> -> vector<16x96xf32>
    %4 = vector.extract_strided_slice %3 {offsets = [0, 0], sizes = [16, 32], strides = [1, 1]} : vector<16x96xf32> to vector<16x32xf32>
    %cst_4 = arith.constant 0.353553385 : f32
    %5 = vector.broadcast %cst_4 : f32 to vector<16x32xf32>
    %6 = arith.mulf %4, %5 : vector<16x32xf32>
    %7 = vector.extract_strided_slice %3 {offsets = [0, 32], sizes = [16, 32], strides = [1, 1]} : vector<16x96xf32> to vector<16x32xf32>
    %8 = vector.extract_strided_slice %3 {offsets = [0, 64], sizes = [16, 32], strides = [1, 1]} : vector<16x96xf32> to vector<16x32xf32>
    %9 = tpu.iota {dimensions = array<i32: 0>} : vector<8x8xi32>
    %10 = tpu.iota {dimensions = array<i32: 1>} : vector<8x8xi32>
    %11 = arith.cmpi sge, %9, %10 : vector<8x8xi32>
    %12 = vector.shape_cast %11 : vector<8x8xi1> to vector<1x8x8xi1>
    %13 = vector.extract_strided_slice %6 {offsets = [0, 0], sizes = [8, 32], strides = [1, 1]} : vector<16x32xf32> to vector<8x32xf32>
    %14 = vector.shape_cast %13 : vector<8x32xf32> to vector<8x4x8xf32>
    %15 = tpu.transpose %14, [1, 0, 2] : vector<8x4x8xf32> -> vector<4x8x8xf32>
    %16 = vector.extract_strided_slice %7 {offsets = [0, 0], sizes = [8, 32], strides = [1, 1]} : vector<16x32xf32> to vector<8x32xf32>
    %17 = vector.shape_cast %16 : vector<8x32xf32> to vector<8x4x8xf32>
    %18 = tpu.transpose %17, [1, 0, 2] : vector<8x4x8xf32> -> vector<4x8x8xf32>
    %19 = vector.extract_strided_slice %8 {offsets = [0, 0], sizes = [8, 32], strides = [1, 1]} : vector<16x32xf32> to vector<8x32xf32>
    %20 = vector.shape_cast %19 : vector<8x32xf32> to vector<8x4x8xf32>
    %21 = tpu.transpose %20, [1, 0, 2] : vector<8x4x8xf32> -> vector<4x8x8xf32>
    %22 = tpu.transpose %18, [0, 2, 1] : vector<4x8x8xf32> -> vector<4x8x8xf32>
    "tpu.trace_start"() <{level = 10 : i32, message = "iqh,ihp->iqp"}> : () -> ()
    %cst_5 = arith.constant dense<0.000000e+00> : vector<4x8x8xf32>
    %23 = tpu.matmul %15, %22, %cst_5 {dimension_numbers = #tpu.dot_dimension_numbers<[2], [1], [1], [2], [0, 0, 0, 1, 1, 2], [0], [0]>} : vector<4x8x8xf32>, vector<4x8x8xf32>, vector<4x8x8xf32> -> vector<4x8x8xf32>
    %cst_6 = arith.constant -1.000000e+10 : f32
    "tpu.trace_stop"() : () -> ()
    %24 = vector.shape_cast %12 : vector<1x8x8xi1> to vector<1x8x8xi1>
    %25 = vector.broadcast %24 : vector<1x8x8xi1> to vector<4x8x8xi1>
    %26 = vector.broadcast %cst_6 : f32 to vector<4x8x8xf32>
    %27 = arith.select %25, %23, %26 : vector<4x8x8xi1>, vector<4x8x8xf32>
    %cst_7 = arith.constant dense<0xFF800000> : vector<4x8xf32>
    %28 = vector.multi_reduction <maximumf>, %27, %cst_7 [2] : vector<4x8x8xf32> to vector<4x8xf32>
    %cst_8 = arith.constant 0xFF800000 : f32
    %29 = vector.broadcast %cst_8 : f32 to vector<4x8xf32>
    %30 = arith.maximumf %29, %28 : vector<4x8xf32>
    %31 = vector.shape_cast %30 : vector<4x8xf32> to vector<4x8x1xf32>
    %32 = vector.broadcast %31 : vector<4x8x1xf32> to vector<4x8x8xf32>
    %33 = arith.subf %27, %32 : vector<4x8x8xf32>
    %34 = math.exp %33 : vector<4x8x8xf32>
    %cst_9 = arith.constant dense<0.000000e+00> : vector<4x8xf32>
    %35 = vector.multi_reduction <add>, %34, %cst_9 [2] : vector<4x8x8xf32> to vector<4x8xf32>
    %36 = vector.shape_cast %35 : vector<4x8xf32> to vector<4x8x1xf32>
    %37 = vector.broadcast %36 : vector<4x8x1xf32> to vector<4x8x8xf32>
    %38 = arith.divf %34, %37 : vector<4x8x8xf32>
    "tpu.trace_start"() <{level = 10 : i32, message = "iqp,iph->iqh"}> : () -> ()
    %cst_10 = arith.constant dense<0.000000e+00> : vector<4x8x8xf32>
    %39 = tpu.matmul %38, %21, %cst_10 {dimension_numbers = #tpu.dot_dimension_numbers<[2], [1], [1], [2], [0, 0, 0, 1, 1, 2], [0], [0]>} : vector<4x8x8xf32>, vector<4x8x8xf32>, vector<4x8x8xf32> -> vector<4x8x8xf32>
    "tpu.trace_stop"() : () -> ()
    %40 = tpu.transpose %39, [1, 0, 2] : vector<4x8x8xf32> -> vector<8x4x8xf32>
    %41 = vector.shape_cast %40 : vector<8x4x8xf32> to vector<8x32xf32>
    %42 = vector.extract_strided_slice %6 {offsets = [8, 0], sizes = [8, 32], strides = [1, 1]} : vector<16x32xf32> to vector<8x32xf32>
    %43 = vector.shape_cast %42 : vector<8x32xf32> to vector<8x4x8xf32>
    %44 = tpu.transpose %43, [1, 0, 2] : vector<8x4x8xf32> -> vector<4x8x8xf32>
    %45 = vector.extract_strided_slice %7 {offsets = [8, 0], sizes = [8, 32], strides = [1, 1]} : vector<16x32xf32> to vector<8x32xf32>
    %46 = vector.shape_cast %45 : vector<8x32xf32> to vector<8x4x8xf32>
    %47 = tpu.transpose %46, [1, 0, 2] : vector<8x4x8xf32> -> vector<4x8x8xf32>
    %48 = vector.extract_strided_slice %8 {offsets = [8, 0], sizes = [8, 32], strides = [1, 1]} : vector<16x32xf32> to vector<8x32xf32>
    %49 = vector.shape_cast %48 : vector<8x32xf32> to vector<8x4x8xf32>
    %50 = tpu.transpose %49, [1, 0, 2] : vector<8x4x8xf32> -> vector<4x8x8xf32>
    %51 = tpu.transpose %47, [0, 2, 1] : vector<4x8x8xf32> -> vector<4x8x8xf32>
    "tpu.trace_start"() <{level = 10 : i32, message = "iqh,ihp->iqp"}> : () -> ()
    %cst_11 = arith.constant dense<0.000000e+00> : vector<4x8x8xf32>
    %52 = tpu.matmul %44, %51, %cst_11 {dimension_numbers = #tpu.dot_dimension_numbers<[2], [1], [1], [2], [0, 0, 0, 1, 1, 2], [0], [0]>} : vector<4x8x8xf32>, vector<4x8x8xf32>, vector<4x8x8xf32> -> vector<4x8x8xf32>
    %cst_12 = arith.constant -1.000000e+10 : f32
    "tpu.trace_stop"() : () -> ()
    %53 = vector.shape_cast %12 : vector<1x8x8xi1> to vector<1x8x8xi1>
    %54 = vector.broadcast %53 : vector<1x8x8xi1> to vector<4x8x8xi1>
    %55 = vector.broadcast %cst_12 : f32 to vector<4x8x8xf32>
    %56 = arith.select %54, %52, %55 : vector<4x8x8xi1>, vector<4x8x8xf32>
    %cst_13 = arith.constant dense<0xFF800000> : vector<4x8xf32>
    %57 = vector.multi_reduction <maximumf>, %56, %cst_13 [2] : vector<4x8x8xf32> to vector<4x8xf32>
    %cst_14 = arith.constant 0xFF800000 : f32
    %58 = vector.broadcast %cst_14 : f32 to vector<4x8xf32>
    %59 = arith.maximumf %58, %57 : vector<4x8xf32>
    %60 = vector.shape_cast %59 : vector<4x8xf32> to vector<4x8x1xf32>
    %61 = vector.broadcast %60 : vector<4x8x1xf32> to vector<4x8x8xf32>
    %62 = arith.subf %56, %61 : vector<4x8x8xf32>
    %63 = math.exp %62 : vector<4x8x8xf32>
    %cst_15 = arith.constant dense<0.000000e+00> : vector<4x8xf32>
    %64 = vector.multi_reduction <add>, %63, %cst_15 [2] : vector<4x8x8xf32> to vector<4x8xf32>
    %65 = vector.shape_cast %64 : vector<4x8xf32> to vector<4x8x1xf32>
    %66 = vector.broadcast %65 : vector<4x8x1xf32> to vector<4x8x8xf32>
    %67 = arith.divf %63, %66 : vector<4x8x8xf32>
    "tpu.trace_start"() <{level = 10 : i32, message = "iqp,iph->iqh"}> : () -> ()
    %cst_16 = arith.constant dense<0.000000e+00> : vector<4x8x8xf32>
    %68 = tpu.matmul %67, %50, %cst_16 {dimension_numbers = #tpu.dot_dimension_numbers<[2], [1], [1], [2], [0, 0, 0, 1, 1, 2], [0], [0]>} : vector<4x8x8xf32>, vector<4x8x8xf32>, vector<4x8x8xf32> -> vector<4x8x8xf32>
    "tpu.trace_stop"() : () -> ()
    %69 = tpu.transpose %68, [1, 0, 2] : vector<4x8x8xf32> -> vector<8x4x8xf32>
    %70 = vector.shape_cast %69 : vector<8x4x8xf32> to vector<8x32xf32>
    %71 = tpu.concatenate %41, %70 in 0 : vector<8x32xf32>, vector<8x32xf32> -> vector<16x32xf32>
    %c0_17 = arith.constant 0 : index
    %c0_18 = arith.constant 0 : index
    %72 = vector.load %arg3[%c0_17, %c0_18] : memref<32x32xf32, #tpu.memory_space<vmem>>, vector<32x32xf32>
    %cst_19 = arith.constant dense<0.000000e+00> : vector<16x32xf32>
    %73 = tpu.matmul %71, %72, %cst_19 {dimension_numbers = #tpu.dot_dimension_numbers<[1], [0], [0], [1], [0, 0, 1, 1], [], []>} : vector<16x32xf32>, vector<32x32xf32>, vector<16x32xf32> -> vector<16x32xf32>
    %74 = vector.shape_cast %73 : vector<16x32xf32> to vector<2x8x32xf32>
    %c0_20 = arith.constant 0 : index
    %c0_21 = arith.constant 0 : index
    %c0_22 = arith.constant 0 : index
    %75 = vector.load %arg4[%c0_20, %c0_21, %c0_22] : memref<2x8x32xf32, #tpu.memory_space<vmem>>, vector<2x8x32xf32>
    tpu.vector_store %arg4[%c0_20, %c0_21, %c0_22], %74 {strides = array<i32>} : memref<2x8x32xf32, #tpu.memory_space<vmem>>, vector<2x8x32xf32>,
    return
  }
  func.func @transform_0(%arg0: i32) -> (i32, i32, i32) {
    %c0_i32 = arith.constant 0 : i32
    %c0_i32_0 = arith.constant 0 : i32
    %c0_i32_1 = arith.constant 0 : i32
    return %arg0, %c0_i32, %c0_i32_0 : i32, i32, i32
  }
  func.func @transform_1(%arg0: i32) -> (i32, i32) {
    %c0_i32 = arith.constant 0 : i32
    %c0_i32_0 = arith.constant 0 : i32
    %c0_i32_1 = arith.constant 0 : i32
    return %c0_i32, %c0_i32_0 : i32, i32
  }
  func.func @transform_2(%arg0: i32) -> (i32, i32) {
    %c0_i32 = arith.constant 0 : i32
    %c0_i32_0 = arith.constant 0 : i32
    %c0_i32_1 = arith.constant 0 : i32
    return %c0_i32, %c0_i32_0 : i32, i32
  }
  func.func @transform_3(%arg0: i32) -> (i32, i32, i32) {
    %c0_i32 = arith.constant 0 : i32
    %c0_i32_0 = arith.constant 0 : i32
    %c0_i32_1 = arith.constant 0 : i32
    return %arg0, %c0_i32, %c0_i32_0 : i32, i32, i32
  }
}

</mosaic_0001>

<bundles_post_ra>
// kernel: tpu_custom_call.1
= control target key start
LH: loop header
LB: loop body
LE: loop exit
PB: predicated region body
PF: predicated region fallthrough
CT: control target
= control target key end

     0   :  { %8 = vsyncpa [#allocation3], 0  ;;  %s2544_s0 = inlined_call_operand.hbm [shape: f32[2,8,32], index: 0, kind: input, shape index: {}]   ;;  %s2545_s1 = inlined_call_operand.hbm [shape: f32[32,96], index: 1, kind: input, shape index: {}]   ;;  %s2546_s2 = inlined_call_operand.hbm [shape: f32[32,32], index: 2, kind: input, shape index: {}]   ;;  %s2547_s3 = inlined_call_operand.hbm [shape: f32[2,8,32], index: 3, kind: output, shape index: {}]  }
   0x1   :  { %9 = vsyncpa [#allocation6], 0 }
   0x2   :  { %10 = vsyncpa [#allocation4], 0  ;;  %s28_s14 = sshll.u32 %s2545_s1, 4  ;;  %s1947_s15 = smov [#allocation5]   ;;  %s29_s14 = int_to_ptr.hbm [resolvable:$true] %s28_s14 }
   0x3   :  { %s30_s16 = sshll.u32 %s1947_s15, 4  ;;  %s15_s19 = sshll.u32 %s2544_s0, 4  ;;  %s31_s16 = int_to_ptr.vmem [resolvable:$true] %s30_s16  ;;  %s16_s19 = int_to_ptr.hbm [resolvable:$true] %s15_s19 }
   0x4   :  { %s1948_s20 = smov 128   ;;  %s1949_s21 = smov 8  }
   0x5   :  { %36 = dma.hbm_to_vmem [thread:$0]  %s29_s14, 512, %s31_s16, [#allocation6], %s1948_s20, %s1948_s20, %s1949_s21  }
   0x6   :  { %s1950_s22 = smov [#allocation2]   ;;  %s41_s1 = sshll.u32 %s2546_s2, 4  ;;  %s42_s1 = int_to_ptr.hbm [resolvable:$true] %s41_s1 }
   0x7   :  { %s17_s23 = sshll.u32 %s1950_s22, 4  ;;  %s1951_s0 = smov [#allocation7]   ;;  %s18_s23 = int_to_ptr.vmem [resolvable:$true] %s17_s23 }
   0x8   :  { %23 = dma.hbm_to_vmem [thread:$0]  %s16_s19, 256, %s18_s23, [#allocation3], %s1948_s20, %s1948_s20, %s1949_s21  }
   0x9   :  { %s43_s26 = sshll.u32 %s1951_s0, 4  ;;  %s44_s26 = int_to_ptr.vmem [resolvable:$true] %s43_s26 }
   0xa   :  { %49 = dma.hbm_to_vmem [thread:$0]  %s42_s1, 512, %s44_s26, [#allocation6], %s1948_s20, %s1948_s20, %s1949_s21  }
   0xb   :  { %1941 = dma.done.wait [#allocation3], 256  }
   0xc   :  { %1942 = vsyncadd [#allocation3], 4294967040 }
   0xd   :  { %1943 = dma.done.wait [#allocation6], 1024  }
   0xe   :  { %1944 = vsyncadd [#allocation6], 4294966272  ;;  %v67_v0 = vld [vmem:[#allocation5 + $0x18] sm:$0xff]  ;;  %v66_v1 = vld [vmem:[#allocation5 + $0x10] sm:$0xff]  ;;  %vm68_vm0 = vcmask 261120   ;;  %s1952_s2 = smov 104  }
   0xf   :  { %87 = vmatpush.msra.mxu0 %v67_v0  ;;  %v65_v2 = vld [vmem:[#allocation5 + $0x8] sm:$0xff]  ;;  %v64_v3 = vld [vmem:[#allocation5] sm:$0xff]  ;;  %v62_v4 = vld [vmem:[#allocation2] sm:$0xff]  ;;  %s1953_s27 = smov 120   ;;  %s1954_s28 = smov 96   ;;  %vm116_vm1 = vcmask 1047556  }
  0x10   :  { %v63_v5 = vld [vmem:[#allocation2 + $0x8] sm:$0xff]  ;;  %s1955_s29 = smov 112   ;;  %s1956_s30 = smov 64   ;;  %v1957_v18 = vmov 1983009808   ;;  %vm477_vm2 = vcmask 64512  }
  0x11   :  { %88 = vmatpush.msra.mxu0 %v66_v1  ;;  %v121_v19 = vunpack.c.l.s4 %v1957_v18  ;;  %v1958_v28 = vmov 1934713408   ;;  %s1959_s4 = smov 24   ;;  %s1960_s5 = smov 16  }
  0x12   :  { %v145_v29 = vunpack.c.l.s4 %v1958_v28  ;;  %s1961_s6 = smov [#allocation8]   ;;  %s1736_s10 = sshll.u32 %s2547_s3, 4  ;;  %s1737_s10 = int_to_ptr.hbm [resolvable:$true] %s1736_s10 }
  0x13   :  { %89 = vmatpush.msra.mxu0 %v65_v2  ;;  %v2026_v24 = vunpack.c.0.s8 %v121_v19  ;;  %s1734_s7 = sshll.u32 %s1961_s6, 4  ;;  %s1735_s7 = int_to_ptr.vmem [resolvable:$true] %s1734_s7 }
  0x14   :  { %v2034_v37 = vunpack.c.0.s8 %v145_v29 }
  0x15   :  { %90 = vmatpush.msra.mxu0 %v64_v3 }
  0x16   :  { %1750 = vmatmul.msk.f32.vlgmr.msra.gmra.mxu0 %vm68_vm0, %v62_v4 }
  0x1e   :  { %1751 = vmatmul.msk.f32.gmra.mxu0 %vm68_vm0, %v63_v5 }
  0x93   :  { %v92_v6 = vpop.f32.mrf.mxu0 }
  0x94   :  { %231 = vrot.lane.b32.xlu1 %v92_v6, %s1952_s2  ;;  %227 = vrot.lane.b32.xlu0 %v92_v6, %s1953_s27  ;;  %v98_v7 = vmul.f32 0.35355338, %v92_v6 }
  0x96   :  { %v118_v32 = vrot.slane %v98_v7, 4 }
  0x9b   :  { %v2007_v8 = vpop.f32.mrf.mxu0 }
  0x9c   :  { %233 = vrot.lane.b32.xlu1 %v92_v6, %s1954_s28  ;;  %229 = vrot.lane.b32.xlu0 %v92_v6, %s1955_s29 }
  0xa4   :  { %106 = vrot.lane.b32.xlu1 %v98_v7, %s1953_s27 }
  0xac   :  { %1024 = vrot.lane.b32.xlu1 %v2007_v8, %s1953_s27 }
 0x106   :  { %v232_v9 = vpop.permute.xlu1 %231  ;;  %v228_v10 = vpop.permute.xlu0 %227 }
 0x107   :  { %v1793_v11 = vpack.i.bf16 %v228_v10, %v92_v6  ;;  %239 = vrot.lane.b32.xlu0 %v232_v9, %s1954_s28  ;;  %235 = vrot.lane.b32.xlu2 %v228_v10, %s1954_s28 }
 0x109   :  { %1794 = vrot.lane.b32.xlu1 %v1793_v11, %s1956_s30 }
 0x10e   :  { %v230_v12 = vpop.permute.xlu0 %229  ;;  %v234_v14 = vpop.permute.xlu1 %233 }
 0x10f   :  { %237 = vrot.lane.b32.xlu2 %v230_v12, %s1954_s28  ;;  %112 = vrot.lane.b32.xlu0 %v98_v7, %s1952_s2  ;;  %v1798_v13 = vpack.i.bf16 %v232_v9, %v230_v12  ;;  %v247_v22 = vrot.slane %v234_v14, 4 }
 0x116   :  { %v2022_v16 = vpop.permute.xlu1 %106 }
 0x117   :  { %109 = vrot.lane.b32.xlu2 %v98_v7, %s1955_s29  ;;  %1028 = vrot.lane.b32.xlu0 %v2007_v8, %s1952_s2  ;;  %v130_v53 = vrot.slane %v2022_v16, 4 }
 0x11e   :  { %v2024_v21 = vpop.permute.xlu1 %1024 }
 0x11f   :  { %1799 = vrot.lane.b32.xlu0 %v1798_v13, %s1956_s30  ;;  %1026 = vrot.lane.b32.xlu2 %v2007_v8, %s1955_s29 }
 0x161   :  { %v236_v15 = vpop.permute.xlu2 %235 }
 0x162   :  { %v259_v33 = vrot.slane %v236_v15, 4 }
 0x169   :  { %v238_v17 = vpop.permute.xlu2 %237 }
 0x16a   :  { %v245_v20 = vrot.slane %v238_v17, 4  ;;  %v248_v26 = vsel %vm116_vm1, %v238_v17, %v247_v22 }
 0x16b   :  { %v256_v31 = vperm.slane %v248_v26, %v2026_v24 }
 0x16c   :  { %v246_v25 = vsel %vm116_vm1, %v245_v20, %v234_v14 }
 0x16d   :  { %v252_v30 = vperm.slane %v246_v25, %v2026_v24  ;;  %v283_v41 = vrot.slane %v256_v31, 4 }
 0x16f   :  { %v271_v40 = vrot.slane %v252_v30, 4 }
 0x171   :  { %v110_v23 = vpop.permute.xlu2 %109 }
 0x172   :  { %v115_v27 = vrot.slane %v110_v23, 4  ;;  %v119_v35 = vsel %vm116_vm1, %v110_v23, %v118_v32 }
 0x173   :  { %v127_v45 = vperm.slane %v119_v35, %v2026_v24 }
 0x174   :  { %v117_v34 = vsel %vm116_vm1, %v115_v27, %v98_v7 }
 0x175   :  { %v123_v44 = vperm.slane %v117_v34, %v2026_v24  ;;  %v154_v57 = vrot.slane %v127_v45, 4 }
 0x177   :  { %v142_v61 = vrot.slane %v123_v44, 4 }
 0x179   :  { %v240_v36 = vpop.permute.xlu0 %239 }
 0x17a   :  { %v257_v38 = vrot.slane %v240_v36, 4  ;;  %v260_v39 = vsel %vm116_vm1, %v240_v36, %v259_v33 }
 0x17b   :  { %v268_v42 = vperm.slane %v260_v39, %v2026_v24  ;;  %v2038_v43 = vpop.permute.xlu1 %1794 }
 0x17c   :  { %v258_v46 = vsel %vm116_vm1, %v257_v38, %v236_v15  ;;  %v1797_v47 = vunpack.i.h.bf16 %v2038_v43  ;;  %v1796_v51 = vunpack.i.l.bf16 %v2038_v43 }
 0x17d   :  { %v264_v48 = vperm.slane %v258_v46, %v2026_v24  ;;  %v281_v49 = vrot.slane %v268_v42, 4  ;;  %v284_v50 = vsel %vm116_vm1, %v268_v42, %v283_v41 }
 0x17e   :  { %v292_v52 = vperm.slane %v284_v50, %v2034_v37  ;;  %v2056_v63 = vrot.slane %v1797_v47, 4  ;;  %v2060_v0 = vrot.slane %v1796_v51, 4 }
 0x17f   :  { %v269_v54 = vrot.slane %v264_v48, 4  ;;  %v272_v55 = vsel %vm116_vm1, %v264_v48, %v271_v40  ;;  %v282_v56 = vsel %vm116_vm1, %v281_v49, %v256_v31 }
 0x180   :  { %v280_v58 = vperm.slane %v272_v55, %v2034_v37  ;;  %v288_v59 = vperm.slane %v282_v56, %v2034_v37  ;;  %v299_v60 = vrot.slane %v292_v52, 4 }
 0x181   :  { %v270_v62 = vsel %vm116_vm1, %v269_v54, %v252_v30  ;;  %v113_v1 = vpop.permute.xlu0 %112 }
 0x182   :  { %v276_v2 = vperm.slane %v270_v62, %v2034_v37  ;;  %v295_v3 = vrot.slane %v280_v58, 4  ;;  %v297_v4 = vrot.slane %v288_v59, 4  ;;  %v300_v5 = vsel %vm116_vm1, 0.0, %v299_v60  ;;  %v2100_v62 = vpop.permute.xlu2 %1026 }
 0x183   :  { %v312_v6 = vsel %vm116_vm1, %v299_v60, %v288_v59  ;;  %v317_v7 = vrot.slane %v300_v5, 4  ;;  %v128_v9 = vrot.slane %v113_v1, 4  ;;  %v131_v10 = vsel %vm116_vm1, %v113_v1, %v130_v53  ;;  %1034 = vrot.lane.b32.xlu0 %v2100_v62, %s1954_s28 }
 0x184   :  { %v293_v11 = vrot.slane %v276_v2, 4  ;;  %v296_v12 = vsel %vm116_vm1, 0.0, %v295_v3  ;;  %v298_v13 = vsel %vm116_vm1, 0.0, %v297_v4  ;;  %v316_v14 = vperm.slane %v312_v6, %v2026_v24 }
 0x185   :  { %v306_v15 = vrot.slane %v296_v12, 4  ;;  %v129_v17 = vsel %vm116_vm1, %v128_v9, %v2022_v16  ;;  %v139_v18 = vperm.slane %v131_v10, %v2026_v24  ;;  %v301_v19 = vsel %vm116_vm1, %v295_v3, %v276_v2 }
 0x186   :  { %v135_v20 = vperm.slane %v129_v17, %v2026_v24  ;;  %v294_v22 = vsel %vm116_vm1, 0.0, %v293_v11  ;;  %v305_v23 = vperm.slane %v301_v19, %v2026_v24  ;;  %v318_v25 = vsel %vm116_vm1, %v317_v7, %v298_v13 }
 0x187   :  { %v152_v26 = vrot.slane %v139_v18, 4  ;;  %v155_v27 = vsel %vm116_vm1, %v139_v18, %v154_v57  ;;  %v307_v28 = vsel %vm116_vm1, %v306_v15, %v294_v22  ;;  %v322_v29 = vperm.slane %v318_v25, %v2026_v24 }
 0x188   :  { %v140_v16 = vrot.slane %v135_v20, 4  ;;  %v143_v30 = vsel %vm116_vm1, %v135_v20, %v142_v61  ;;  %v163_v31 = vperm.slane %v155_v27, %v2034_v37  ;;  %v311_v32 = vperm.slane %v307_v28, %v2026_v24 }
 0x189   :  { %v151_v33 = vperm.slane %v143_v30, %v2034_v37  ;;  %v153_v34 = vsel %vm116_vm1, %v152_v26, %v127_v45  ;;  %v2085_v35 = vpop.permute.xlu0 %1028  ;;  %v325_v36 = vrot.slane %v305_v23, 4  ;;  %v337_v38 = vrot.slane %v316_v14, 4 }
 0x18a   :  { %v141_v39 = vsel %vm116_vm1, %v140_v16, %v123_v44  ;;  %v159_v40 = vperm.slane %v153_v34, %v2034_v37  ;;  %v170_v41 = vrot.slane %v163_v31, 4  ;;  %v323_v42 = vrot.slane %v311_v32, 4 }
 0x18b   :  { %v147_v46 = vperm.slane %v141_v39, %v2034_v37  ;;  %v166_v48 = vrot.slane %v151_v33, 4  ;;  %v326_v49 = vsel %vm116_vm1, %v311_v32, %v325_v36  ;;  %v338_v50 = vsel %vm116_vm1, %v322_v29, %v337_v38 }
 0x18c   :  { %v168_v52 = vrot.slane %v159_v40, 4  ;;  %v171_v45 = vsel %vm116_vm1, 0.0, %v170_v41  ;;  %v183_v53 = vsel %vm116_vm1, %v170_v41, %v159_v40  ;;  %v334_v54 = vperm.slane %v326_v49, %v2034_v37 }
 0x18d   :  { %v164_v55 = vrot.slane %v147_v46, 4  ;;  %v167_v44 = vsel %vm116_vm1, 0.0, %v166_v48  ;;  %v187_v56 = vperm.slane %v183_v53, %v2026_v24  ;;  %v188_v57 = vrot.slane %v171_v45, 4 }
 0x18e   :  { %v169_v58 = vsel %vm116_vm1, 0.0, %v168_v52  ;;  %v177_v59 = vrot.slane %v167_v44, 4  ;;  %v346_v60 = vperm.slane %v338_v50, %v2034_v37  ;;  %v324_v61 = vsel %vm116_vm1, %v323_v42, %v305_v23 }
 0x18f   :  { %v189_v1 = vsel %vm116_vm1, %v188_v57, %v169_v58  ;;  %v330_v2 = vperm.slane %v324_v61, %v2034_v37  ;;  %v335_v3 = vrot.slane %v322_v29, 4  ;;  %v353_v4 = vrot.slane %v334_v54, 4 }
 0x190   :  { %v351_v5 = vrot.slane %v346_v60, 4  ;;  %v165_v6 = vsel %vm116_vm1, 0.0, %v164_v55  ;;  %v172_v7 = vsel %vm116_vm1, %v166_v48, %v147_v46  ;;  %v193_v9 = vperm.slane %v189_v1, %v2026_v24 }
 0x191   :  { %v336_v10 = vsel %vm116_vm1, %v335_v3, %v316_v14  ;;  %v354_v11 = vsel %vm116_vm1, %v346_v60, %v353_v4  ;;  %v1800_v12 = vpop.permute.xlu0 %1799  ;;  %v349_v13 = vrot.slane %v330_v2, 4  ;;  %v176_v15 = vperm.slane %v172_v7, %v2026_v24 }
 0x192   :  { %v352_v17 = vsel %vm116_vm1, %v351_v5, %v334_v54  ;;  %v342_v18 = vperm.slane %v336_v10, %v2034_v37  ;;  %v1802_v19 = vunpack.i.h.bf16 %v1800_v12  ;;  %v1801_v20 = vunpack.i.l.bf16 %v1800_v12 }
 0x193   :  { %1756 = vmatpush.xpose.msk.msrb.mxu0 %vm477_vm2, %v352_v17  ;;  %v178_v22 = vsel %vm116_vm1, %v177_v59, %v165_v6  ;;  %v196_v23 = vrot.slane %v176_v15, 4  ;;  %v208_v25 = vrot.slane %v187_v56, 4  ;;  %v206_v26 = vrot.slane %v193_v9, 4 }
 0x194   :  { %v347_v14 = vrot.slane %v342_v18, 4  ;;  %v379_v27 = vrot.slane %v1802_v19, 4  ;;  %v367_v28 = vrot.slane %v1801_v20, 4  ;;  %v370_v29 = vsel %vm116_vm1, %v1801_v20, %v2060_v0 }
 0x195   :  { %v378_v16 = vperm.slane %v370_v29, %v2026_v24  ;;  %v382_v30 = vsel %vm116_vm1, %v1802_v19, %v2056_v63  ;;  %v350_v31 = vsel %vm116_vm1, %v342_v18, %v349_v13  ;;  %v182_v32 = vperm.slane %v178_v22, %v2026_v24 }
 0x196   :  { %v348_v33 = vsel %vm116_vm1, %v347_v14, %v330_v2  ;;  %v368_v34 = vsel %vm116_vm1, %v367_v28, %v1796_v51  ;;  %v380_v36 = vsel %vm116_vm1, %v379_v27, %v1797_v47  ;;  %v390_v0 = vperm.slane %v382_v30, %v2026_v24  ;;  %1754 = vmatpush.xpose.msk.msra.mxu2 %vm477_vm2, %v350_v31 }
 0x197   :  { %1752 = vmatpush.xpose.msk.msra.mxu1 %vm477_vm2, %v348_v33  ;;  %v374_v63 = vperm.slane %v368_v34, %v2026_v24  ;;  %v386_v38 = vperm.slane %v380_v36, %v2026_v24  ;;  %v405_v39 = vrot.slane %v378_v16, 4  ;;  %v197_v40 = vsel %vm116_vm1, %v182_v32, %v196_v23 }
 0x198   :  { %v403_v51 = vrot.slane %v390_v0, 4  ;;  %v205_v43 = vperm.slane %v197_v40, %v2034_v37  ;;  %v209_v47 = vsel %vm116_vm1, %v193_v9, %v208_v25  ;;  %v194_v41 = vrot.slane %v182_v32, 4 }
 0x199   :  { %v391_v42 = vrot.slane %v386_v38, 4  ;;  %v393_v46 = vrot.slane %v374_v63, 4  ;;  %v406_v48 = vsel %vm116_vm1, %v390_v0, %v405_v39  ;;  %v217_v49 = vperm.slane %v209_v47, %v2034_v37 }
 0x19a   :  { %v404_v50 = vsel %vm116_vm1, %v403_v51, %v378_v16  ;;  %v414_v52 = vperm.slane %v406_v48, %v2034_v37  ;;  %v195_v45 = vsel %vm116_vm1, %v194_v41, %v176_v15  ;;  %v207_v53 = vsel %vm116_vm1, %v206_v26, %v187_v56 }
 0x19b   :  { %1758 = vmatpush.xpose.msk.msrb.mxu1 %vm477_vm2, %v354_v11  ;;  %v392_v54 = vsel %vm116_vm1, %v391_v42, %v374_v63  ;;  %v394_v55 = vsel %vm116_vm1, %v386_v38, %v393_v46  ;;  %v410_v44 = vperm.slane %v404_v50, %v2034_v37  ;;  %v222_v57 = vrot.slane %v217_v49, 4 }
 0x19c   :  { %v398_v58 = vperm.slane %v392_v54, %v2034_v37  ;;  %v402_v59 = vperm.slane %v394_v55, %v2034_v37  ;;  %v421_v60 = vrot.slane %v414_v52, 4  ;;  %v201_v61 = vperm.slane %v195_v45, %v2034_v37 }
 0x19d   :  { %v419_v1 = vrot.slane %v410_v44, 4  ;;  %v223_v2 = vsel %vm116_vm1, %v222_v57, %v205_v43  ;;  %v213_v3 = vperm.slane %v207_v53, %v2034_v37  ;;  %v224_v29 = vrot.slane %v205_v43, 4 }
 0x19e   :  { %v415_v56 = vrot.slane %v398_v58, 4  ;;  %v417_v4 = vrot.slane %v402_v59, 4  ;;  %v422_v5 = vsel %vm116_vm1, 0.0, %v421_v60  ;;  %1757 = vmatmul.msk.f32.vlgmr.msrb.gmra.mxu0 %vm477_vm2, %v223_v2  ;;  %v434_v6 = vsel %vm116_vm1, %v421_v60, %v410_v44 }
 0x19f   :  { %v439_v7 = vrot.slane %v422_v5, 4  ;;  %v218_v9 = vrot.slane %v213_v3, 4  ;;  %v220_v10 = vrot.slane %v201_v61, 4  ;;  %v420_v12 = vsel %vm116_vm1, 0.0, %v419_v1 }
 0x1a0   :  { %v418_v11 = vsel %vm116_vm1, 0.0, %v417_v4  ;;  %v423_v13 = vsel %vm116_vm1, %v417_v4, %v398_v58  ;;  %v416_v20 = vsel %vm116_vm1, 0.0, %v415_v56  ;;  %v438_v22 = vperm.slane %v434_v6, %v2026_v24 }
 0x1a1   :  { %v428_v15 = vrot.slane %v418_v11, 4  ;;  %v219_v17 = vsel %vm116_vm1, %v218_v9, %v201_v61  ;;  %v221_v18 = vsel %vm116_vm1, %v213_v3, %v220_v10  ;;  %v427_v19 = vperm.slane %v423_v13, %v2026_v24 }
 0x1a2   :  { %1753 = vmatmul.msk.f32.vlgmr.msra.gmra.mxu1 %vm477_vm2, %v219_v17  ;;  %1755 = vmatmul.msk.f32.vlgmr.msra.gmra.mxu2 %vm477_vm2, %v221_v18  ;;  %v440_v23 = vsel %vm116_vm1, %v439_v7, %v420_v12  ;;  %v459_v28 = vrot.slane %v438_v22, 4  ;;  %v225_v38 = vsel %vm116_vm1, %v217_v49, %v224_v29  ;;  %v100_v49 = vlaneseq }
 0x1a3   :  { %v429_v25 = vsel %vm116_vm1, %v428_v15, %v416_v20  ;;  %v444_v26 = vperm.slane %v440_v23, %v2026_v24  ;;  %v447_v14 = vrot.slane %v427_v19, 4 }
 0x1a4   :  { %v433_v27 = vperm.slane %v429_v25, %v2026_v24  ;;  %v101_v50 = vshrl.u32 %v100_v49, 7  ;;  %v103_v52 = vand.u32 127, %v100_v49  ;;  %v2216_v25 = vmul.f32 0.35355338, %v2007_v8 }
 0x1a5   :  { %v457_v16 = vrot.slane %v444_v26, 4  ;;  %v460_v31 = vsel %vm116_vm1, %v444_v26, %v459_v28 }
 0x1a6   :  { %v448_v30 = vsel %vm116_vm1, %v433_v27, %v447_v14  ;;  %v445_v32 = vrot.slane %v433_v27, 4  ;;  %v468_v34 = vperm.slane %v460_v31, %v2034_v37  ;;  %vm2184_vm3 = vcmp.ge.s32.totalorder %v101_v50, %v103_v52 }
 0x1a7   :  { %v456_v33 = vperm.slane %v448_v30, %v2034_v37  ;;  %v458_v36 = vsel %vm116_vm1, %v457_v16, %v438_v22 }
 0x1a8   :  { %v446_v0 = vsel %vm116_vm1, %v445_v32, %v427_v19  ;;  %v464_v63 = vperm.slane %v458_v36, %v2034_v37  ;;  %v473_v39 = vrot.slane %v468_v34, 4 }
 0x1a9   :  { %v452_v40 = vperm.slane %v446_v0, %v2034_v37  ;;  %v475_v51 = vrot.slane %v456_v33, 4 }
 0x1aa   :  { %1759 = vmatmul.msk.f32.vlgmr.msrb.gmra.mxu1 %vm477_vm2, %v225_v38  ;;  %v469_v43 = vrot.slane %v464_v63, 4  ;;  %v474_v47 = vsel %vm116_vm1, %v473_v39, %v456_v33 }
 0x1ab   :  { %v476_v41 = vsel %vm116_vm1, %v468_v34, %v475_v51  ;;  %v471_v42 = vrot.slane %v452_v40, 4  ;;  %748 = vmatpush.msra.mxu1 %v474_v47 }
 0x1ac   :  { %v470_v46 = vsel %vm116_vm1, %v469_v43, %v452_v40 }
 0x1ad   :  { %702 = vmatpush.msrb.mxu2 %v470_v46  ;;  %v472_v48 = vsel %vm116_vm1, %v464_v63, %v471_v42 }
 0x1ae   :  { %725 = vmatpush.msra.mxu3 %v472_v48 }
 0x1af   :  { %771 = vmatpush.msra.mxu2 %v476_v41 }
 0x1f5   :  { %v2204_v4 = vpop.permute.xlu0 %1034 }
 0x21b   :  { %v553_v53 = vpop.f32.mrf.mxu0 }
 0x21c   :  { %v586_v54 = vsel %vm2184_vm3, %v553_v53, -1e+10 }
 0x21d   :  { %v594_v55 = vsel %vm477_vm2, %v586_v54, -inf }
 0x21e   :  { %595 = vmax.xlane.f32.xlu2 %v594_v55 }
 0x21f   :  { %v501_v44 = vpop.f32.mrf.mxu1 }
 0x220   :  { %v584_v57 = vsel %vm2184_vm3, %v501_v44, -1e+10 }
 0x221   :  { %v588_v58 = vsel %vm477_vm2, %v584_v57, -inf }
 0x222   :  { %589 = vmax.xlane.f32.xlu1 %v588_v58 }
 0x225   :  { %v527_v59 = vpop.f32.mrf.mxu2 }
 0x226   :  { %v585_v60 = vsel %vm2184_vm3, %v527_v59, -1e+10 }
 0x227   :  { %v579_v61 = vpop.f32.mrf.mxu1  ;;  %v591_v1 = vsel %vm477_vm2, %v585_v60, -inf }
 0x228   :  { %v587_v2 = vsel %vm2184_vm3, %v579_v61, -1e+10  ;;  %592 = vmax.xlane.f32.xlu2 %v591_v1 }
 0x229   :  { %v597_v3 = vsel %vm477_vm2, %v587_v2, -inf }
 0x22a   :  { %598 = vmax.xlane.f32.xlu0 %v597_v3 }
 0x23b   :  { %1030 = vrot.lane.b32.xlu1 %v2007_v8, %s1954_s28 }
 0x240   :  { %1032 = vrot.lane.b32.xlu2 %v2024_v21, %s1954_s28 }
 0x291   :  { %v596_v56 = vpop.xlane.xlu2 %595 }
 0x292   :  { %v602_v26 = vsub.f32 %v586_v54, %v596_v56 }
 0x294   :  { %v608_v14 = vmul.f32 1.442695, %v602_v26 }
 0x295   :  { %v590_v5 = vpop.xlane.xlu1 %589 }
 0x296   :  { %v600_v6 = vsub.f32 %v584_v57, %v590_v5 }
 0x298   :  { %v604_v7 = vmul.f32 1.442695, %v600_v6 }
 0x29a   :  { %1813 = vpow2.f32 %v604_v7 }
 0x29b   :  { %v593_v9 = vpop.xlane.xlu2 %592 }
 0x29c   :  { %v601_v10 = vsub.f32 %v585_v60, %v593_v9 }
 0x29d   :  { %v599_v11 = vpop.xlane.xlu0 %598 }
 0x29e   :  { %v603_v12 = vsub.f32 %v587_v2, %v599_v11  ;;  %v606_v13 = vmul.f32 1.442695, %v601_v10  ;;  %v915_v10 = vrot.slane %v2216_v25, 4 }
 0x2a0   :  { %v1814_v15 = vpop.eup %1813  ;;  %v610_v17 = vmul.f32 1.442695, %v603_v12  ;;  %1815 = vpow2.f32 %v606_v13 }
 0x2a1   :  { %v612_v18 = vsel %vm477_vm2, %v1814_v15, 0.0 }
 0x2a2   :  { %1817 = vpow2.f32 %v610_v17  ;;  %613 = vadd.xlane.f32.xlu2 %v612_v18  ;;  %v1042_v17 = vrot.slane %v2204_v4, 4 }
 0x2a3   :  { %1819 = vpow2.f32 %v608_v14  ;;  %v2230_v29 = vpop.permute.xlu2 %1032 }
 0x2a6   :  { %v2207_v19 = vpop.eup %1815 }
 0x2a7   :  { %v615_v20 = vsel %vm477_vm2, %v2207_v19, 0.0 }
 0x2a8   :  { %v2211_v22 = vpop.eup %1817  ;;  %616 = vadd.xlane.f32.xlu0 %v615_v20 }
 0x2a9   :  { %v621_v23 = vsel %vm477_vm2, %v2211_v22, 0.0  ;;  %v2226_v27 = vpop.eup %1819 }
 0x2aa   :  { %622 = vadd.xlane.f32.xlu1 %v621_v23  ;;  %v618_v28 = vsel %vm477_vm2, %v2226_v27, 0.0 }
 0x2ad   :  { %v2232_v16 = vpop.permute.xlu1 %1030 }
 0x2ae   :  { %v1044_v12 = vrot.slane %v2232_v16, 4 }
 0x2ba   :  { %904 = vrot.lane.b32.xlu2 %v2216_v25, %s1953_s27 }
 0x2bc   :  { %907 = vrot.lane.b32.xlu0 %v2216_v25, %s1955_s29 }
 0x2c2   :  { %910 = vrot.lane.b32.xlu2 %v2216_v25, %s1952_s2 }
 0x2c3   :  { %1036 = vrot.lane.b32.xlu1 %v2085_v35, %s1954_s28 }
 0x2e6   :  { %619 = vadd.xlane.f32.xlu0 %v618_v28 }
 0x315   :  { %v614_v30 = vpop.xlane.xlu2 %613 }
 0x316   :  { %1821 = vrcp.f32 %v614_v30  ;;  %v633_v63 = vand.u32 2147483647, %v614_v30  ;;  %v635_v38 = vand.u32 2147483648, %v614_v30  ;;  %vm629_vm5 = vweird.f32 %v614_v30 }
 0x318   :  { %vm634_vm7 = vcmp.eq.f32.partialorder %v633_v63, 8.507059e+37  ;;  %v636_v41 = vor.u32 1.1754944e-38, %v635_v38  ;;  %v1056_v63 = vrot.slane %v2230_v29, 4 }
 0x31b   :  { %v617_v31 = vpop.xlane.xlu0 %616 }
 0x31c   :  { %v1822_v32 = vpop.eup %1821  ;;  %1823 = vrcp.f32 %v617_v31  ;;  %v650_v48 = vand.u32 2147483648, %v617_v31  ;;  %v648_v54 = vand.u32 2147483647, %v617_v31  ;;  %vm644_vm9 = vweird.f32 %v617_v31 }
 0x31d   :  { %v625_v33 = vmul.f32 %v1822_v32, %v614_v30  ;;  %v623_v34 = vpop.xlane.xlu1 %622  ;;  %v905_v36 = vpop.permute.xlu2 %904  ;;  %vm630_vm4 = vweird.f32 %v1822_v32  ;;  %v1043_v30 = vsel %vm116_vm1, %v1042_v17, %v2232_v16 }
 0x31e   :  { %1825 = vrcp.f32 %v623_v34  ;;  %vm631_vm6 = vmor %vm629_vm5, %vm630_vm4  ;;  %v927_v52 = vrot.slane %v905_v36, 4  ;;  %v678_v59 = vand.u32 2147483647, %v623_v34  ;;  %v680_v60 = vand.u32 2147483648, %v623_v34 }
 0x31f   :  { %v626_v0 = vsub.f32 1.0, %v625_v33  ;;  %vm674_vm11 = vweird.f32 %v623_v34  ;;  %v651_v3 = vor.u32 1.1754944e-38, %v650_v48  ;;  %vm649_vm13 = vcmp.eq.f32.partialorder %v648_v54, 8.507059e+37 }
 0x320   :  { %v681_v7 = vor.u32 1.1754944e-38, %v680_v60  ;;  %vm679_vm15 = vcmp.eq.f32.partialorder %v678_v59, 8.507059e+37  ;;  %v1049_v16 = vperm.slane %v1043_v30, %v2026_v24 }
 0x321   :  { %v627_v39 = vmul.f32 %v1822_v32, %v626_v0 }
 0x322   :  { %v1824_v40 = vpop.eup %1823 }
 0x323   :  { %v628_v51 = vadd.f32 %v1822_v32, %v627_v39  ;;  %v640_v43 = vmul.f32 %v1824_v40, %v617_v31  ;;  %vm645_vm8 = vweird.f32 %v1824_v40 }
 0x324   :  { %v1826_v47 = vpop.eup %1825  ;;  %vm646_vm12 = vmor %vm644_vm9, %vm645_vm8 }
 0x325   :  { %v670_v42 = vmul.f32 %v1826_v47, %v623_v34  ;;  %v641_v46 = vsub.f32 1.0, %v640_v43  ;;  %v911_v49 = vpop.permute.xlu2 %910  ;;  %v632_v50 = vsel %vm631_vm6, %v1822_v32, %v628_v51  ;;  %vm675_vm10 = vweird.f32 %v1826_v47 }
 0x326   :  { %v637_v53 = vsel %vm634_vm7, %v636_v41, %v632_v50  ;;  %v925_v57 = vrot.slane %v911_v49, 4  ;;  %v928_v1 = vsel %vm116_vm1, %v911_v49, %v927_v52  ;;  %vm676_vm14 = vmor %vm674_vm11, %vm675_vm10 }
 0x327   :  { %v671_v55 = vsub.f32 1.0, %v670_v42  ;;  %v642_v44 = vmul.f32 %v1824_v40, %v641_v46  ;;  %v638_v58 = vmul.f32 %v1814_v15, %v637_v53  ;;  %v936_v9 = vperm.slane %v928_v1, %v2026_v24 }
 0x328   :  { %v926_v5 = vsel %vm116_vm1, %v925_v57, %v905_v36  ;;  %v1068_v53 = vrot.slane %v1049_v16, 4 }
 0x329   :  { %v672_v61 = vmul.f32 %v1826_v47, %v671_v55  ;;  %1760 = vmatmul.msk.f32.vlgmr.msrb.gmra.mxu2 %vm477_vm2, %v638_v58  ;;  %v643_v2 = vadd.f32 %v1824_v40, %v642_v44  ;;  %v932_v20 = vperm.slane %v926_v5, %v2026_v24  ;;  %v949_v31 = vrot.slane %v936_v9, 4 }
 0x32b   :  { %v673_v56 = vadd.f32 %v1826_v47, %v672_v61  ;;  %v647_v6 = vsel %vm646_vm12, %v1824_v40, %v643_v2  ;;  %v937_v34 = vrot.slane %v932_v20, 4 }
 0x32c   :  { %v652_v11 = vsel %vm649_vm13, %v651_v3, %v647_v6 }
 0x32d   :  { %v677_v13 = vsel %vm676_vm14, %v1826_v47, %v673_v56  ;;  %v653_v15 = vmul.f32 %v2207_v19, %v652_v11  ;;  %v1045_v19 = vsel %vm116_vm1, %v2204_v4, %v1044_v12 }
 0x32e   :  { %v682_v18 = vsel %vm679_vm15, %v681_v7, %v677_v13  ;;  %v908_v23 = vpop.permute.xlu0 %907  ;;  %v1053_v39 = vperm.slane %v1045_v19, %v2026_v24 }
 0x32f   :  { %v913_v26 = vrot.slane %v908_v23, 4  ;;  %v916_v14 = vsel %vm116_vm1, %v908_v23, %v915_v10  ;;  %1761 = vmatmul.msk.f32.vlgmr.msra.gmra.mxu3 %vm477_vm2, %v653_v15  ;;  %v683_v28 = vmul.f32 %v2211_v22, %v682_v18 }
 0x330   :  { %v924_v32 = vperm.slane %v916_v14, %v2026_v24  ;;  %v1080_v54 = vrot.slane %v1053_v39, 4 }
 0x331   :  { %v914_v33 = vsel %vm116_vm1, %v913_v26, %v2216_v25  ;;  %1763 = vmatmul.msk.f32.vlgmr.msra.gmra.mxu2 %vm477_vm2, %v683_v28 }
 0x332   :  { %v920_v36 = vperm.slane %v914_v33, %v2026_v24  ;;  %v950_v0 = vsel %vm116_vm1, %v949_v31, %v924_v32  ;;  %v951_v22 = vrot.slane %v924_v32, 4 }
 0x333   :  { %v956_v38 = vperm.slane %v950_v0, %v2034_v37 }
 0x334   :  { %v938_v4 = vsel %vm116_vm1, %v937_v34, %v920_v36  ;;  %v939_v40 = vrot.slane %v920_v36, 4  ;;  %v952_v25 = vsel %vm116_vm1, %v936_v9, %v951_v22 }
 0x335   :  { %v944_v51 = vperm.slane %v938_v4, %v2034_v37  ;;  %v960_v43 = vperm.slane %v952_v25, %v2034_v37  ;;  %v965_v47 = vrot.slane %v956_v38, 4  ;;  %v1037_v41 = vpop.permute.xlu1 %1036 }
 0x336   :  { %v940_v42 = vsel %vm116_vm1, %v932_v20, %v939_v40  ;;  %v1054_v46 = vrot.slane %v1037_v41, 4  ;;  %v1057_v48 = vsel %vm116_vm1, %v1037_v41, %v1056_v63 }
 0x337   :  { %v948_v49 = vperm.slane %v940_v42, %v2034_v37  ;;  %v961_v50 = vrot.slane %v944_v51, 4  ;;  %v967_v52 = vrot.slane %v960_v43, 4  ;;  %v1065_v44 = vperm.slane %v1057_v48, %v2026_v24 }
 0x338   :  { %v1055_v55 = vsel %vm116_vm1, %v1054_v46, %v2230_v29  ;;  %v966_v58 = vsel %vm116_vm1, 0.0, %v965_v47 }
 0x339   :  { %v963_v57 = vrot.slane %v948_v49, 4  ;;  %v968_v59 = vsel %vm116_vm1, 0.0, %v967_v52  ;;  %v980_v60 = vsel %vm116_vm1, %v967_v52, %v956_v38  ;;  %v962_v61 = vsel %vm116_vm1, 0.0, %v961_v50 }
 0x33a   :  { %v985_v1 = vrot.slane %v968_v59, 4  ;;  %v1061_v2 = vperm.slane %v1055_v55, %v2026_v24  ;;  %v1078_v3 = vrot.slane %v1065_v44, 4  ;;  %v984_v5 = vperm.slane %v980_v60, %v2026_v24 }
 0x33b   :  { %v964_v56 = vsel %vm116_vm1, 0.0, %v963_v57  ;;  %v1081_v29 = vsel %vm116_vm1, %v1065_v44, %v1080_v54  ;;  %v969_v6 = vsel %vm116_vm1, %v963_v57, %v944_v51 }
 0x33c   :  { %v974_v7 = vrot.slane %v964_v56, 4  ;;  %v986_v9 = vsel %vm116_vm1, %v985_v1, %v966_v58  ;;  %v1066_v10 = vrot.slane %v1061_v2, 4  ;;  %v1069_v11 = vsel %vm116_vm1, %v1061_v2, %v1068_v53 }
 0x33d   :  { %v990_v12 = vperm.slane %v986_v9, %v2026_v24  ;;  %v1077_v13 = vperm.slane %v1069_v11, %v2034_v37  ;;  %v1079_v15 = vsel %vm116_vm1, %v1078_v3, %v1053_v39  ;;  %v1089_v17 = vperm.slane %v1081_v29, %v2034_v37 }
 0x33e   :  { %v1067_v18 = vsel %vm116_vm1, %v1066_v10, %v1049_v16  ;;  %v1085_v20 = vperm.slane %v1079_v15, %v2034_v37  ;;  %v973_v23 = vperm.slane %v969_v6, %v2026_v24  ;;  %v975_v26 = vsel %vm116_vm1, %v974_v7, %v962_v61 }
 0x33f   :  { %v1073_v14 = vperm.slane %v1067_v18, %v2034_v37  ;;  %v1092_v28 = vrot.slane %v1077_v13, 4  ;;  %v1096_v30 = vrot.slane %v1089_v17, 4  ;;  %v979_v31 = vperm.slane %v975_v26, %v2026_v24 }
 0x340   :  { %v1094_v32 = vrot.slane %v1085_v20, 4  ;;  %v993_v19 = vrot.slane %v973_v23, 4  ;;  %v1003_v33 = vrot.slane %v990_v12, 4  ;;  %v1005_v34 = vrot.slane %v984_v5, 4 }
 0x341   :  { %v1090_v36 = vrot.slane %v1073_v14, 4  ;;  %v1093_v0 = vsel %vm116_vm1, 0.0, %v1092_v28  ;;  %v1097_v22 = vsel %vm116_vm1, 0.0, %v1096_v30  ;;  %v1098_v63 = vsel %vm116_vm1, %v1092_v28, %v1073_v14 }
 0x342   :  { %v1095_v16 = vsel %vm116_vm1, 0.0, %v1094_v32  ;;  %v1103_v38 = vrot.slane %v1093_v0, 4  ;;  %v1109_v39 = vsel %vm116_vm1, %v1096_v30, %v1085_v20  ;;  %v1114_v4 = vrot.slane %v1097_v22, 4 }
 0x343   :  { %v1091_v40 = vsel %vm116_vm1, 0.0, %v1090_v36  ;;  %v1113_v25 = vperm.slane %v1109_v39, %v2026_v24  ;;  %v1102_v51 = vperm.slane %v1098_v63, %v2026_v24  ;;  %v991_v43 = vrot.slane %v979_v31, 4 }
 0x344   :  { %v1115_v47 = vsel %vm116_vm1, %v1114_v4, %v1095_v16  ;;  %v1104_v41 = vsel %vm116_vm1, %v1103_v38, %v1091_v40  ;;  %v1004_v42 = vsel %vm116_vm1, %v1003_v33, %v984_v5  ;;  %v994_v46 = vsel %vm116_vm1, %v979_v31, %v993_v19 }
 0x345   :  { %v1119_v48 = vperm.slane %v1115_v47, %v2026_v24  ;;  %v1134_v49 = vrot.slane %v1113_v25, 4  ;;  %v1108_v50 = vperm.slane %v1104_v41, %v2026_v24  ;;  %v1122_v52 = vrot.slane %v1102_v51, 4 }
 0x346   :  { %v992_v53 = vsel %vm116_vm1, %v991_v43, %v973_v23  ;;  %v1002_v54 = vperm.slane %v994_v46, %v2034_v37  ;;  %v1010_v61 = vperm.slane %v1004_v42, %v2034_v37  ;;  %v1006_v56 = vsel %vm116_vm1, %v990_v12, %v1005_v34 }
 0x347   :  { %v1123_v55 = vsel %vm116_vm1, %v1108_v50, %v1122_v52  ;;  %v1135_v44 = vsel %vm116_vm1, %v1119_v48, %v1134_v49  ;;  %v1120_v57 = vrot.slane %v1108_v50, 4  ;;  %v1132_v58 = vrot.slane %v1119_v48, 4 }
 0x348   :  { %v1131_v59 = vperm.slane %v1123_v55, %v2034_v37  ;;  %v1143_v60 = vperm.slane %v1135_v44, %v2034_v37  ;;  %v998_v3 = vperm.slane %v992_v53, %v2034_v37  ;;  %v1021_v9 = vrot.slane %v1002_v54, 4 }
 0x349   :  { %v1121_v1 = vsel %vm116_vm1, %v1120_v57, %v1102_v51  ;;  %v1133_v2 = vsel %vm116_vm1, %v1132_v58, %v1113_v25  ;;  %v1015_v17 = vrot.slane %v1010_v61, 4  ;;  %v1014_v12 = vperm.slane %v1006_v56, %v2034_v37 }
 0x34a   :  { %v1148_v5 = vrot.slane %v1143_v60, 4  ;;  %v1127_v29 = vperm.slane %v1121_v1, %v2034_v37  ;;  %v1139_v6 = vperm.slane %v1133_v2, %v2034_v37  ;;  %v1150_v7 = vrot.slane %v1131_v59, 4 }
 0x34b   :  { %v1017_v18 = vrot.slane %v998_v3, 4  ;;  %v1022_v26 = vsel %vm116_vm1, %v1014_v12, %v1021_v9  ;;  %v1016_v14 = vsel %vm116_vm1, %v1015_v17, %v998_v3  ;;  %v1019_v39 = vrot.slane %v1014_v12, 4 }
 0x34c   :  { %v1149_v10 = vsel %vm116_vm1, %v1148_v5, %v1131_v59  ;;  %v1144_v11 = vrot.slane %v1139_v6, 4  ;;  %v1146_v13 = vrot.slane %v1127_v29, 4  ;;  %v1151_v15 = vsel %vm116_vm1, %v1143_v60, %v1150_v7 }
 0x34d   :  { %1768 = vmatpush.xpose.msk.msrb.mxu1 %vm477_vm2, %v1149_v10  ;;  %1770 = vmatpush.xpose.msk.msrb.mxu2 %vm477_vm2, %v1151_v15  ;;  %v1018_v28 = vsel %vm116_vm1, %v1010_v61, %v1017_v18  ;;  %v1020_v4 = vsel %vm116_vm1, %v1019_v39, %v1002_v54  ;;  %v1803_v1 = vpack.i.bf16 %v2024_v21, %v2007_v8 }
 0x34e   :  { %v1145_v20 = vsel %vm116_vm1, %v1144_v11, %v1127_v29  ;;  %v1147_v23 = vsel %vm116_vm1, %v1139_v6, %v1146_v13 }
 0x34f   :  { %1764 = vmatpush.xpose.msk.msrb.mxu3 %vm477_vm2, %v1145_v20  ;;  %1766 = vmatpush.xpose.msk.msra.mxu0 %vm477_vm2, %v1147_v23 }
 0x350   :  { %1771 = vmatmul.msk.f32.vlgmr.msrb.gmra.mxu2 %vm477_vm2, %v1022_v26 }
 0x352   :  { %1765 = vmatmul.msk.f32.vlgmr.msrb.gmra.mxu3 %vm477_vm2, %v1016_v14  ;;  %1767 = vmatmul.msk.f32.vlgmr.msra.gmra.mxu0 %vm477_vm2, %v1018_v28 }
 0x359   :  { %v620_v30 = vpop.xlane.xlu0 %619 }
 0x35a   :  { %1827 = vrcp.f32 %v620_v30  ;;  %v665_v33 = vand.u32 2147483648, %v620_v30  ;;  %v663_v36 = vand.u32 2147483647, %v620_v30  ;;  %vm659_vm5 = vweird.f32 %v620_v30 }
 0x35c   :  { %v666_v22 = vor.u32 1.1754944e-38, %v665_v33  ;;  %vm664_vm7 = vcmp.eq.f32.partialorder %v663_v36, 8.507059e+37 }
 0x360   :  { %v1828_v31 = vpop.eup %1827 }
 0x361   :  { %v655_v32 = vmul.f32 %v1828_v31, %v620_v30  ;;  %vm660_vm4 = vweird.f32 %v1828_v31 }
 0x362   :  { %vm661_vm6 = vmor %vm659_vm5, %vm660_vm4 }
 0x363   :  { %v656_v19 = vsub.f32 1.0, %v655_v32 }
 0x365   :  { %v657_v34 = vmul.f32 %v1828_v31, %v656_v19 }
 0x367   :  { %v658_v0 = vadd.f32 %v1828_v31, %v657_v34 }
 0x369   :  { %v662_v63 = vsel %vm661_vm6, %v1828_v31, %v658_v0 }
 0x36a   :  { %v667_v16 = vsel %vm664_vm7, %v666_v22, %v662_v63 }
 0x36b   :  { %v668_v38 = vmul.f32 %v2226_v27, %v667_v16 }
 0x36d   :  { %1762 = vmatmul.msk.f32.vlgmr.msra.gmra.mxu1 %vm477_vm2, %v668_v38 }
 0x375   :  { %1769 = vmatmul.msk.f32.vlgmr.msrb.gmra.mxu1 %vm477_vm2, %v1020_v4 }
 0x3ac   :  { %v704_v40 = vpop.f32.mrf.mxu2 }
 0x3ad   :  { %v778_v57 = vrot.slane %v704_v40, 4 }
 0x3b2   :  { %v727_v51 = vpop.f32.mrf.mxu3 }
 0x3b3   :  { %v790_v52 = vrot.slane %v727_v51, 4 }
 0x3b4   :  { %v773_v25 = vpop.f32.mrf.mxu2 }
 0x3b5   :  { %v788_v53 = vrot.slane %v773_v25, 4  ;;  %v791_v54 = vsel %vm116_vm1, %v773_v25, %v790_v52 }
 0x3b6   :  { %v799_v44 = vperm.slane %v791_v54, %v2026_v24 }
 0x3b7   :  { %v789_v55 = vsel %vm116_vm1, %v788_v53, %v727_v51 }
 0x3b8   :  { %v795_v58 = vperm.slane %v789_v55, %v2026_v24  ;;  %v812_v2 = vrot.slane %v799_v44, 4 }
 0x3ba   :  { %v800_v5 = vrot.slane %v795_v58, 4 }
 0x3cf   :  { %v1323_v48 = vpop.f32.mrf.mxu0 }
 0x3d0   :  { %v2352_v49 = vsel %vm2184_vm3, %v1323_v48, -1e+10 }
 0x3d1   :  { %v1385_v50 = vsel %vm477_vm2, %v2352_v49, -inf }
 0x3d3   :  { %v1375_v43 = vpop.f32.mrf.mxu2 }
 0x3d4   :  { %v2340_v47 = vsel %vm2184_vm3, %v1375_v43, -1e+10 }
 0x3d5   :  { %v1297_v41 = vpop.f32.mrf.mxu3  ;;  %v1391_v42 = vsel %vm477_vm2, %v2340_v47, -inf }
 0x3d6   :  { %v2346_v27 = vsel %vm2184_vm3, %v1297_v41, -1e+10  ;;  %1392 = vmax.xlane.f32.xlu2 %v1391_v42 }
 0x3d7   :  { %v1382_v46 = vsel %vm477_vm2, %v2346_v27, -inf }
 0x3d8   :  { %1383 = vmax.xlane.f32.xlu1 %v1382_v46 }
 0x3e0   :  { %1386 = vmax.xlane.f32.xlu1 %v1385_v50 }
 0x3ea   :  { %v750_v59 = vpop.f32.mrf.mxu1 }
 0x3eb   :  { %v776_v60 = vrot.slane %v750_v59, 4  ;;  %v779_v61 = vsel %vm116_vm1, %v750_v59, %v778_v57 }
 0x3ec   :  { %v787_v3 = vperm.slane %v779_v61, %v2026_v24 }
 0x3ed   :  { %v777_v56 = vsel %vm116_vm1, %v776_v60, %v704_v40  ;;  %v1808_v60 = vpack.i.bf16 %v2085_v35, %v2100_v62 }
 0x3ee   :  { %v783_v29 = vperm.slane %v777_v56, %v2026_v24  ;;  %v813_v6 = vsel %vm116_vm1, %v812_v2, %v787_v3  ;;  %v814_v7 = vrot.slane %v787_v3, 4  ;;  %1804 = vrot.lane.b32.xlu2 %v1803_v1, %s1956_s30 }
 0x3ef   :  { %v819_v9 = vperm.slane %v813_v6, %v2034_v37 }
 0x3f0   :  { %v801_v10 = vsel %vm116_vm1, %v800_v5, %v783_v29  ;;  %v802_v11 = vrot.slane %v783_v29, 4  ;;  %v815_v8 = vsel %vm116_vm1, %v799_v44, %v814_v7 }
 0x3f1   :  { %v807_v21 = vperm.slane %v801_v10, %v2034_v37  ;;  %v823_v13 = vperm.slane %v815_v8, %v2034_v37  ;;  %v828_v12 = vrot.slane %v819_v9, 4 }
 0x3f2   :  { %v803_v15 = vsel %vm116_vm1, %v795_v58, %v802_v11  ;;  %v1349_v17 = vpop.f32.mrf.mxu1 }
 0x3f3   :  { %v811_v18 = vperm.slane %v803_v15, %v2034_v37  ;;  %v830_v20 = vrot.slane %v823_v13, 4  ;;  %v2377_v23 = vsel %vm2184_vm3, %v1349_v17, -1e+10  ;;  %v824_v26 = vrot.slane %v807_v21, 4 }
 0x3f4   :  { %v1388_v30 = vsel %vm477_vm2, %v2377_v23, -inf  ;;  %v829_v33 = vsel %vm116_vm1, 0.0, %v828_v12 }
 0x3f5   :  { %v826_v14 = vrot.slane %v811_v18, 4  ;;  %v831_v28 = vsel %vm116_vm1, 0.0, %v830_v20  ;;  %1389 = vmax.xlane.f32.xlu0 %v1388_v30  ;;  %v843_v32 = vsel %vm116_vm1, %v830_v20, %v819_v9  ;;  %v825_v63 = vsel %vm116_vm1, 0.0, %v824_v26 }
 0x3f6   :  { %v848_v31 = vrot.slane %v831_v28, 4  ;;  %v847_v45 = vperm.slane %v843_v32, %v2026_v24 }
 0x3f7   :  { %v827_v19 = vsel %vm116_vm1, 0.0, %v826_v14  ;;  %v832_v34 = vsel %vm116_vm1, %v826_v14, %v807_v21 }
 0x3f8   :  { %v837_v36 = vrot.slane %v827_v19, 4  ;;  %v836_v0 = vperm.slane %v832_v34, %v2026_v24  ;;  %v849_v22 = vsel %vm116_vm1, %v848_v31, %v829_v33  ;;  %v868_v38 = vrot.slane %v847_v45, 4 }
 0x3f9   :  { %v853_v16 = vperm.slane %v849_v22, %v2026_v24 }
 0x3fa   :  { %v838_v39 = vsel %vm116_vm1, %v837_v36, %v825_v63  ;;  %v856_v4 = vrot.slane %v836_v0, 4 }
 0x3fb   :  { %v842_v40 = vperm.slane %v838_v39, %v2026_v24  ;;  %v866_v25 = vrot.slane %v853_v16, 4  ;;  %v869_v51 = vsel %vm116_vm1, %v853_v16, %v868_v38 }
 0x3fc   :  { %v877_v43 = vperm.slane %v869_v51, %v2034_v37 }
 0x3fd   :  { %v854_v41 = vrot.slane %v842_v40, 4  ;;  %v867_v42 = vsel %vm116_vm1, %v866_v25, %v847_v45  ;;  %v857_v46 = vsel %vm116_vm1, %v842_v40, %v856_v4 }
 0x3fe   :  { %v873_v48 = vperm.slane %v867_v42, %v2034_v37  ;;  %v865_v50 = vperm.slane %v857_v46, %v2034_v37  ;;  %v882_v52 = vrot.slane %v877_v43, 4 }
 0x3ff   :  { %v855_v53 = vsel %vm116_vm1, %v854_v41, %v836_v0 }
 0x400   :  { %v861_v54 = vperm.slane %v855_v53, %v2034_v37  ;;  %v878_v55 = vrot.slane %v873_v48, 4  ;;  %v2402_v44 = vsel %vm116_vm1, %v882_v52, %v865_v50  ;;  %v884_v61 = vrot.slane %v865_v50, 4 }
 0x402   :  { %v880_v57 = vrot.slane %v861_v54, 4  ;;  %v2405_v58 = vsel %vm116_vm1, %v878_v55, %v861_v54  ;;  %v885_v1 = vsel %vm116_vm1, %v877_v43, %v884_v61 }
 0x404   :  { %v881_v59 = vsel %vm116_vm1, %v873_v48, %v880_v57 }
 0x405   :  { %887 = vrot.lane.b32.xlu2 %v881_v59, %s1949_s21 }
 0x409   :  { %1809 = vrot.lane.b32.xlu0 %v1808_v60, %s1956_s30 }
 0x40d   :  { %895 = vrot.lane.b32.xlu2 %v885_v1, %s1959_s4 }
 0x449   :  { %v1393_v2 = vpop.xlane.xlu2 %1392 }
 0x44a   :  { %v1397_v5 = vsub.f32 %v2340_v47, %v1393_v2 }
 0x44b   :  { %v1384_v3 = vpop.xlane.xlu1 %1383 }
 0x44c   :  { %v1394_v56 = vsub.f32 %v2346_v27, %v1384_v3  ;;  %v1404_v6 = vmul.f32 1.442695, %v1397_v5 }
 0x44e   :  { %v1398_v29 = vmul.f32 1.442695, %v1394_v56 }
 0x450   :  { %1829 = vpow2.f32 %v1398_v29 }
 0x451   :  { %1831 = vpow2.f32 %v1404_v6  ;;  %v1805_v18 = vpop.permute.xlu2 %1804 }
 0x452   :  { %v1807_v12 = vunpack.i.h.bf16 %v1805_v18  ;;  %v1806_v20 = vunpack.i.l.bf16 %v1805_v18 }
 0x453   :  { %v1387_v7 = vpop.xlane.xlu1 %1386 }
 0x454   :  { %v1395_v35 = vsub.f32 %v2352_v49, %v1387_v7  ;;  %v1178_v14 = vrot.slane %v1807_v12, 4  ;;  %v1166_v28 = vrot.slane %v1806_v20, 4 }
 0x456   :  { %v2417_v62 = vpop.eup %1829  ;;  %v1400_v9 = vmul.f32 1.442695, %v1395_v35 }
 0x457   :  { %v1406_v10 = vsel %vm477_vm2, %v2417_v62, 0.0  ;;  %v2421_v11 = vpop.eup %1831 }
 0x458   :  { %1833 = vpow2.f32 %v1400_v9  ;;  %1407 = vadd.xlane.f32.xlu1 %v1406_v10  ;;  %v1415_v47 = vsel %vm477_vm2, %v2421_v11, 0.0 }
 0x45e   :  { %v2423_v27 = vpop.eup %1833 }
 0x45f   :  { %v1409_v8 = vsel %vm477_vm2, %v2423_v27, 0.0 }
 0x460   :  { %1416 = vadd.xlane.f32.xlu1 %v1415_v47  ;;  %1410 = vadd.xlane.f32.xlu0 %v1409_v8 }
 0x468   :  { %v1390_v49 = vpop.xlane.xlu0 %1389 }
 0x469   :  { %v1396_v21 = vsub.f32 %v2377_v23, %v1390_v49 }
 0x46b   :  { %v1402_v13 = vmul.f32 1.442695, %v1396_v21 }
 0x46d   :  { %1835 = vpow2.f32 %v1402_v13 }
 0x473   :  { %v2430_v15 = vpop.eup %1835 }
 0x474   :  { %v1412_v17 = vsel %vm477_vm2, %v2430_v15, 0.0 }
 0x475   :  { %1413 = vadd.xlane.f32.xlu1 %v1412_v17 }
 0x47b   :  { %v1810_v26 = vpop.permute.xlu0 %1809 }
 0x47c   :  { %v1812_v30 = vunpack.i.h.bf16 %v1810_v26  ;;  %v1811_v31 = vunpack.i.l.bf16 %v1810_v26 }
 0x47e   :  { %v1176_v32 = vrot.slane %v1812_v30, 4  ;;  %v1179_v19 = vsel %vm116_vm1, %v1812_v30, %v1178_v14  ;;  %v1164_v23 = vrot.slane %v1811_v31, 4  ;;  %v1167_v33 = vsel %vm116_vm1, %v1811_v31, %v1166_v28 }
 0x47f   :  { %v1187_v34 = vperm.slane %v1179_v19, %v2026_v24  ;;  %v1175_v45 = vperm.slane %v1167_v33, %v2026_v24 }
 0x480   :  { %v1177_v36 = vsel %vm116_vm1, %v1176_v32, %v1807_v12  ;;  %v1165_v0 = vsel %vm116_vm1, %v1164_v23, %v1806_v20 }
 0x481   :  { %v1183_v22 = vperm.slane %v1177_v36, %v2026_v24  ;;  %v1200_v63 = vrot.slane %v1187_v34, 4  ;;  %v1171_v16 = vperm.slane %v1165_v0, %v2026_v24  ;;  %v1202_v38 = vrot.slane %v1175_v45, 4 }
 0x483   :  { %v1188_v39 = vrot.slane %v1183_v22, 4  ;;  %v1190_v4 = vrot.slane %v1171_v16, 4  ;;  %v1201_v40 = vsel %vm116_vm1, %v1200_v63, %v1175_v45  ;;  %v1203_v25 = vsel %vm116_vm1, %v1187_v34, %v1202_v38 }
 0x484   :  { %v1207_v51 = vperm.slane %v1201_v40, %v2034_v37  ;;  %v1211_v43 = vperm.slane %v1203_v25, %v2034_v37 }
 0x485   :  { %v1189_v41 = vsel %vm116_vm1, %v1188_v39, %v1171_v16  ;;  %v1191_v42 = vsel %vm116_vm1, %v1183_v22, %v1190_v4 }
 0x486   :  { %v1195_v46 = vperm.slane %v1189_v41, %v2034_v37  ;;  %v1199_v48 = vperm.slane %v1191_v42, %v2034_v37  ;;  %v1216_v50 = vrot.slane %v1207_v51, 4  ;;  %v1218_v52 = vrot.slane %v1211_v43, 4 }
 0x488   :  { %v1212_v53 = vrot.slane %v1195_v46, 4  ;;  %v1214_v54 = vrot.slane %v1199_v48, 4  ;;  %v1219_v55 = vsel %vm116_vm1, 0.0, %v1218_v52  ;;  %v1231_v57 = vsel %vm116_vm1, %v1218_v52, %v1207_v51  ;;  %v1697_v52 = vld [vmem:[#allocation7 + $0x10] sm:$0xff] }
 0x489   :  { %v1236_v59 = vrot.slane %v1219_v55, 4  ;;  %v1217_v61 = vsel %vm116_vm1, 0.0, %v1216_v50  ;;  %v1235_v2 = vperm.slane %v1231_v57, %v2026_v24  ;;  %v1698_v50 = vld [vmem:[#allocation7 + $0x18] sm:$0xff] }
 0x48a   :  { %v1215_v60 = vsel %vm116_vm1, 0.0, %v1214_v54  ;;  %v1220_v1 = vsel %vm116_vm1, %v1214_v54, %v1195_v46  ;;  %v1213_v29 = vsel %vm116_vm1, 0.0, %v1212_v53 }
 0x48b   :  { %v1225_v3 = vrot.slane %v1215_v60, 4  ;;  %v1224_v56 = vperm.slane %v1220_v1, %v2026_v24  ;;  %v1237_v5 = vsel %vm116_vm1, %v1236_v59, %v1217_v61  ;;  %v1256_v7 = vrot.slane %v1235_v2, 4  ;;  %v1696_v60 = vld [vmem:[#allocation7 + $0x8] sm:$0xff] }
 0x48c   :  { %v1241_v6 = vperm.slane %v1237_v5, %v2026_v24 }
 0x48d   :  { %v1226_v35 = vsel %vm116_vm1, %v1225_v3, %v1213_v29  ;;  %v1244_v9 = vrot.slane %v1224_v56, 4  ;;  %v1695_v29 = vld [vmem:[#allocation7] sm:$0xff] }
 0x48e   :  { %891 = vrot.lane.b32.xlu1 %v2402_v44, %s1960_s5  ;;  %v1230_v10 = vperm.slane %v1226_v35, %v2026_v24  ;;  %v1257_v47 = vsel %vm116_vm1, %v1241_v6, %v1256_v7  ;;  %v1254_v8 = vrot.slane %v1241_v6, 4 }
 0x48f   :  { %v1265_v49 = vperm.slane %v1257_v47, %v2034_v37 }
 0x490   :  { %v1245_v21 = vsel %vm116_vm1, %v1230_v10, %v1244_v9  ;;  %v1242_v13 = vrot.slane %v1230_v10, 4  ;;  %v1255_v17 = vsel %vm116_vm1, %v1254_v8, %v1235_v2 }
 0x491   :  { %v1253_v18 = vperm.slane %v1245_v21, %v2034_v37  ;;  %v1270_v12 = vrot.slane %v1265_v49, 4  ;;  %v1261_v20 = vperm.slane %v1255_v17, %v2034_v37 }
 0x492   :  { %v1243_v26 = vsel %vm116_vm1, %v1242_v13, %v1224_v56 }
 0x493   :  { %v1271_v44 = vsel %vm116_vm1, %v1270_v12, %v1253_v18  ;;  %v1249_v14 = vperm.slane %v1243_v26, %v2034_v37  ;;  %v1266_v28 = vrot.slane %v1261_v20, 4  ;;  %v1272_v30 = vrot.slane %v1253_v18, 4 }
 0x494   :  { %1542 = vmatpush.msra.mxu1 %v1271_v44 }
 0x495   :  { %v1267_v31 = vsel %vm116_vm1, %v1266_v28, %v1249_v14  ;;  %v1273_v32 = vsel %vm116_vm1, %v1265_v49, %v1272_v30  ;;  %v1268_v19 = vrot.slane %v1249_v14, 4 }
 0x496   :  { %1496 = vmatpush.msra.mxu3 %v1267_v31  ;;  %1565 = vmatpush.msra.mxu2 %v1273_v32 }
 0x497   :  { %v1269_v23 = vsel %vm116_vm1, %v1261_v20, %v1268_v19  ;;  %v888_v20 = vpop.permute.xlu2 %887 }
 0x498   :  { %1519 = vmatpush.msrb.mxu0 %v1269_v23  ;;  %1717 = vmatpush.msrb.mxu3 %v1698_v50  ;;  %v898_v14 = vsel %vm477_vm2, %v2405_v58, %v888_v20 }
 0x49a   :  { %1718 = vmatpush.msrb.mxu3 %v1697_v52 }
 0x49c   :  { %1719 = vmatpush.msrb.mxu3 %v1696_v60 }
 0x49e   :  { %1720 = vmatpush.msrb.mxu3 %v1695_v29 }
 0x49f   :  { %v896_v30 = vpop.permute.xlu2 %895 }
 0x4cb   :  { %v1408_v33 = vpop.xlane.xlu1 %1407 }
 0x4cc   :  { %1837 = vrcp.f32 %v1408_v33  ;;  %v1429_v63 = vand.u32 2147483648, %v1408_v33  ;;  %v1427_v38 = vand.u32 2147483647, %v1408_v33  ;;  %vm1423_vm8 = vweird.f32 %v1408_v33 }
 0x4ce   :  { %v1430_v40 = vor.u32 1.1754944e-38, %v1429_v63  ;;  %vm1428_vm10 = vcmp.eq.f32.partialorder %v1427_v38, 8.507059e+37 }
 0x4d2   :  { %v1838_v34 = vpop.eup %1837 }
 0x4d3   :  { %v1419_v45 = vmul.f32 %v1838_v34, %v1408_v33  ;;  %v1411_v36 = vpop.xlane.xlu0 %1410  ;;  %v1417_v0 = vpop.xlane.xlu1 %1416  ;;  %vm1424_vm3 = vweird.f32 %v1838_v34 }
 0x4d4   :  { %1839 = vrcp.f32 %v1411_v36  ;;  %vm1425_vm9 = vmor %vm1423_vm8, %vm1424_vm3  ;;  %v1444_v53 = vand.u32 2147483648, %v1411_v36  ;;  %v1442_v57 = vand.u32 2147483647, %v1411_v36  ;;  %v1474_v59 = vand.u32 2147483648, %v1417_v0 }
 0x4d5   :  { %v1420_v22 = vsub.f32 1.0, %v1419_v45  ;;  %1841 = vrcp.f32 %v1417_v0  ;;  %v1472_v1 = vand.u32 2147483647, %v1417_v0  ;;  %vm1438_vm13 = vweird.f32 %v1411_v36 }
 0x4d6   :  { %vm1468_vm15 = vweird.f32 %v1417_v0  ;;  %vm1443_vm4 = vcmp.eq.f32.partialorder %v1442_v57, 8.507059e+37  ;;  %v1475_v5 = vor.u32 1.1754944e-38, %v1474_v59 }
 0x4d7   :  { %v1421_v16 = vmul.f32 %v1838_v34, %v1420_v22  ;;  %vm1473_vm6 = vcmp.eq.f32.partialorder %v1472_v1, 8.507059e+37 }
 0x4d9   :  { %v1422_v39 = vadd.f32 %v1838_v34, %v1421_v16 }
 0x4da   :  { %v1840_v4 = vpop.eup %1839 }
 0x4db   :  { %v1842_v25 = vpop.eup %1841  ;;  %v1426_v51 = vsel %vm1425_vm9, %v1838_v34, %v1422_v39  ;;  %v1434_v43 = vmul.f32 %v1840_v4, %v1411_v36  ;;  %vm1439_vm11 = vweird.f32 %v1840_v4 }
 0x4dc   :  { %v1431_v41 = vsel %vm1428_vm10, %v1430_v40, %v1426_v51  ;;  %v1464_v42 = vmul.f32 %v1842_v25, %v1417_v0  ;;  %vm1469_vm12 = vweird.f32 %v1842_v25  ;;  %vm1440_vm14 = vmor %vm1438_vm13, %vm1439_vm11  ;;  %vm899_vm10 = vcmask 130048  }
 0x4dd   :  { %v1435_v46 = vsub.f32 1.0, %v1434_v43  ;;  %v1432_v48 = vmul.f32 %v2417_v62, %v1431_v41  ;;  %v1445_v62 = vor.u32 1.1754944e-38, %v1444_v53  ;;  %vm1470_vm5 = vmor %vm1468_vm15, %vm1469_vm12  ;;  %vm901_vm11 = vcmask 195584  }
 0x4de   :  { %v1465_v54 = vsub.f32 1.0, %v1464_v42 }
 0x4df   :  { %v1436_v55 = vmul.f32 %v1840_v4, %v1435_v46  ;;  %1772 = vmatmul.msk.f32.vlgmr.msra.gmra.mxu3 %vm477_vm2, %v1432_v48 }
 0x4e0   :  { %v1466_v61 = vmul.f32 %v1842_v25, %v1465_v54 }
 0x4e1   :  { %v1437_v2 = vadd.f32 %v1840_v4, %v1436_v55 }
 0x4e2   :  { %v1467_v3 = vadd.f32 %v1842_v25, %v1466_v61 }
 0x4e3   :  { %v1441_v56 = vsel %vm1440_vm14, %v1840_v4, %v1437_v2 }
 0x4e4   :  { %v1446_v6 = vsel %vm1443_vm4, %v1445_v62, %v1441_v56  ;;  %v1471_v7 = vsel %vm1470_vm5, %v1842_v25, %v1467_v3 }
 0x4e5   :  { %v1447_v35 = vmul.f32 %v2423_v27, %v1446_v6  ;;  %v1476_v9 = vsel %vm1473_vm6, %v1475_v5, %v1471_v7 }
 0x4e6   :  { %v1477_v10 = vmul.f32 %v2421_v11, %v1476_v9 }
 0x4e7   :  { %1773 = vmatmul.msk.f32.vlgmr.msrb.gmra.mxu0 %vm477_vm2, %v1447_v35 }
 0x4e8   :  { %1775 = vmatmul.msk.f32.vlgmr.msra.gmra.mxu2 %vm477_vm2, %v1477_v10  ;;  %v1414_v47 = vpop.xlane.xlu1 %1413 }
 0x4e9   :  { %1843 = vrcp.f32 %v1414_v47  ;;  %v1459_v13 = vand.u32 2147483648, %v1414_v47  ;;  %v1457_v18 = vand.u32 2147483647, %v1414_v47  ;;  %vm1453_vm3 = vweird.f32 %v1414_v47 }
 0x4eb   :  { %v1460_v27 = vor.u32 1.1754944e-38, %v1459_v13  ;;  %vm1458_vm9 = vcmp.eq.f32.partialorder %v1457_v18, 8.507059e+37 }
 0x4ef   :  { %v1844_v8 = vpop.eup %1843 }
 0x4f0   :  { %v1449_v49 = vmul.f32 %v1844_v8, %v1414_v47  ;;  %vm1454_vm7 = vweird.f32 %v1844_v8 }
 0x4f1   :  { %vm1455_vm8 = vmor %vm1453_vm3, %vm1454_vm7 }
 0x4f2   :  { %v1450_v21 = vsub.f32 1.0, %v1449_v49 }
 0x4f4   :  { %v1451_v17 = vmul.f32 %v1844_v8, %v1450_v21 }
 0x4f6   :  { %v1452_v12 = vadd.f32 %v1844_v8, %v1451_v17 }
 0x4f8   :  { %v1456_v26 = vsel %vm1455_vm8, %v1844_v8, %v1452_v12 }
 0x4f9   :  { %v1461_v11 = vsel %vm1458_vm9, %v1460_v27, %v1456_v26 }
 0x4fa   :  { %v1462_v44 = vmul.f32 %v2430_v15, %v1461_v11 }
 0x4fc   :  { %1774 = vmatmul.msk.f32.vlgmr.msra.gmra.mxu1 %vm477_vm2, %v1462_v44 }
 0x500   :  { %v892_v28 = vpop.permute.xlu1 %891 }
 0x501   :  { %v900_v31 = vsel %vm899_vm10, %v898_v14, %v892_v28 }
 0x502   :  { %v902_v32 = vsel %vm901_vm11, %v900_v31, %v896_v30 }
 0x503   :  { %1776 = vmatmul.msk.f32.vlgmr.msrb.gmra.mxu3 %vm68_vm0, %v902_v32 }
 0x562   :  { %v1498_v45 = vpop.f32.mrf.mxu3 }
 0x563   :  { %v1572_v58 = vrot.slane %v1498_v45, 4 }
 0x564   :  { %v1521_v19 = vpop.f32.mrf.mxu0 }
 0x565   :  { %v1584_v33 = vrot.slane %v1521_v19, 4 }
 0x56b   :  { %v1567_v23 = vpop.f32.mrf.mxu2 }
 0x56c   :  { %v1582_v34 = vrot.slane %v1567_v23, 4  ;;  %v1585_v15 = vsel %vm116_vm1, %v1567_v23, %v1584_v33 }
 0x56d   :  { %v1593_v0 = vperm.slane %v1585_v15, %v2026_v24 }
 0x56e   :  { %v1583_v36 = vsel %vm116_vm1, %v1582_v34, %v1521_v19 }
 0x56f   :  { %v1589_v22 = vperm.slane %v1583_v36, %v2026_v24  ;;  %v1606_v39 = vrot.slane %v1593_v0, 4 }
 0x571   :  { %v1594_v25 = vrot.slane %v1589_v22, 4 }
 0x579   :  { %v1544_v63 = vpop.f32.mrf.mxu1 }
 0x57a   :  { %v1570_v16 = vrot.slane %v1544_v63, 4  ;;  %v1573_v38 = vsel %vm116_vm1, %v1544_v63, %v1572_v58 }
 0x57b   :  { %v1581_v4 = vperm.slane %v1573_v38, %v2026_v24 }
 0x57c   :  { %v1571_v40 = vsel %vm116_vm1, %v1570_v16, %v1498_v45 }
 0x57d   :  { %v1577_v51 = vperm.slane %v1571_v40, %v2026_v24  ;;  %v1607_v43 = vsel %vm116_vm1, %v1606_v39, %v1581_v4  ;;  %v1608_v41 = vrot.slane %v1581_v4, 4 }
 0x57e   :  { %v1613_v42 = vperm.slane %v1607_v43, %v2034_v37 }
 0x57f   :  { %v1595_v46 = vsel %vm116_vm1, %v1594_v25, %v1577_v51  ;;  %v1596_v48 = vrot.slane %v1577_v51, 4  ;;  %v1609_v50 = vsel %vm116_vm1, %v1593_v0, %v1608_v41 }
 0x580   :  { %v1601_v52 = vperm.slane %v1595_v46, %v2034_v37  ;;  %v1617_v53 = vperm.slane %v1609_v50, %v2034_v37  ;;  %v1622_v57 = vrot.slane %v1613_v42, 4 }
 0x581   :  { %v1597_v54 = vsel %vm116_vm1, %v1589_v22, %v1596_v48 }
 0x582   :  { %v1605_v55 = vperm.slane %v1597_v54, %v2034_v37  ;;  %v1624_v59 = vrot.slane %v1617_v53, 4  ;;  %v1618_v60 = vrot.slane %v1601_v52, 4  ;;  %v1623_v5 = vsel %vm116_vm1, 0.0, %v1622_v57 }
 0x584   :  { %v1620_v61 = vrot.slane %v1605_v55, 4  ;;  %v1625_v1 = vsel %vm116_vm1, 0.0, %v1624_v59  ;;  %v1637_v2 = vsel %vm116_vm1, %v1624_v59, %v1613_v42  ;;  %v1619_v10 = vsel %vm116_vm1, 0.0, %v1618_v60 }
 0x585   :  { %v1642_v62 = vrot.slane %v1625_v1, 4  ;;  %v1641_v3 = vperm.slane %v1637_v2, %v2026_v24 }
 0x586   :  { %v1621_v56 = vsel %vm116_vm1, 0.0, %v1620_v61  ;;  %v1626_v29 = vsel %vm116_vm1, %v1620_v61, %v1601_v52  ;;  %v1722_v6 = vpop.f32.mrf.mxu3 }
 0x587   :  { %v1631_v7 = vrot.slane %v1621_v56, 4  ;;  %1728 = vst.msk [vmem:[#allocation8] sm:$0xff] %vm68_vm0, %v1722_v6  ;;  %v1630_v35 = vperm.slane %v1626_v29, %v2026_v24  ;;  %v1643_v9 = vsel %vm116_vm1, %v1642_v62, %v1623_v5  ;;  %v1662_v8 = vrot.slane %v1641_v3, 4 }
 0x588   :  { %v1647_v47 = vperm.slane %v1643_v9, %v2026_v24 }
 0x589   :  { %v1632_v49 = vsel %vm116_vm1, %v1631_v7, %v1619_v10  ;;  %v1650_v21 = vrot.slane %v1630_v35, 4 }
 0x58a   :  { %v1636_v13 = vperm.slane %v1632_v49, %v2026_v24  ;;  %v1660_v17 = vrot.slane %v1647_v47, 4  ;;  %v1663_v12 = vsel %vm116_vm1, %v1647_v47, %v1662_v8 }
 0x58b   :  { %v1671_v14 = vperm.slane %v1663_v12, %v2034_v37 }
 0x58c   :  { %v1651_v18 = vsel %vm116_vm1, %v1636_v13, %v1650_v21  ;;  %v1648_v20 = vrot.slane %v1636_v13, 4  ;;  %v1661_v27 = vsel %vm116_vm1, %v1660_v17, %v1641_v3 }
 0x58d   :  { %v1659_v26 = vperm.slane %v1651_v18, %v2034_v37  ;;  %v1667_v11 = vperm.slane %v1661_v27, %v2034_v37  ;;  %v1676_v33 = vrot.slane %v1671_v14, 4 }
 0x58e   :  { %v1649_v44 = vsel %vm116_vm1, %v1648_v20, %v1630_v35 }
 0x58f   :  { %v1678_v28 = vrot.slane %v1659_v26, 4  ;;  %v1655_v30 = vperm.slane %v1649_v44, %v2034_v37  ;;  %v1672_v24 = vrot.slane %v1667_v11, 4  ;;  %v1677_v34 = vsel %vm116_vm1, %v1676_v33, %v1659_v26 }
 0x591   :  { %v1679_v31 = vsel %vm116_vm1, %v1671_v14, %v1678_v28  ;;  %v1674_v32 = vrot.slane %v1655_v30, 4  ;;  %v1673_v19 = vsel %vm116_vm1, %v1672_v24, %v1655_v30 }
 0x592   :  { %1689 = vrot.lane.b32.xlu1 %v1679_v31, %s1959_s4 }
 0x593   :  { %v1675_v23 = vsel %vm116_vm1, %v1667_v11, %v1674_v32 }
 0x594   :  { %1681 = vrot.lane.b32.xlu2 %v1675_v23, %s1949_s21 }
 0x59c   :  { %1685 = vrot.lane.b32.xlu2 %v1677_v34, %s1960_s5 }
 0x5ee   :  { %v1682_v15 = vpop.permute.xlu2 %1681 }
 0x5ef   :  { %v1692_v37 = vsel %vm477_vm2, %v1673_v19, %v1682_v15 }
 0x5f6   :  { %v1686_v45 = vpop.permute.xlu2 %1685 }
 0x5f7   :  { %v1693_v36 = vsel %vm899_vm10, %v1692_v37, %v1686_v45 }
 0x604   :  { %v1690_v0 = vpop.permute.xlu1 %1689 }
 0x605   :  { %v1694_v58 = vsel %vm901_vm11, %v1693_v36, %v1690_v0 }
 0x606   :  { %1777 = vmatmul.msk.f32.gmra.mxu3 %vm68_vm0, %v1694_v58 }
 0x689   :  { %v1725_v22 = vpop.f32.mrf.mxu3 }
 0x68a   :  { %1729 = vst.msk [vmem:[#allocation8 + $0x8] sm:$0xff] %vm68_vm0, %v1725_v22 }
 0x68b   :  { %1742 = dma.vmem_to_hbm [thread:$0]  %s1735_s7, 256, %s1737_s10, [#allocation4], %s1948_s20, %s1948_s20, %s1949_s21  }
 0x68c   :  { %1945 = dma.done.wait [#allocation4], 256  }
 0x68d   :  { %1946 = vsyncadd [#allocation4], 4294967040 }
 0x68e   :  { %1747 = vsyncpa [#allocation3], 1 }
 0x68f   :  { %1748 = vsyncpa [#allocation6], 1 }
 0x690   :  { %1749 = vsyncpa [#allocation4], 1 }

</bundles_post_ra>
